<compile_context>
chip_gen: v6e
topology: v6e:2x2x1
jax: 0.10.0
libtpu: 0.0.40
codegen_flags: <defaults>
</compile_context>

<pallas_src>
import jax
import jax.numpy as jnp
from jax.experimental import pallas as pl
from jax.experimental.pallas import tpu as pltpu

HIDDEN = 512
TAB_DIM = 25
TAB_PAD = 128          # lane-dense padded tabular width
TAB_HID = 128
NUM_CLASSES = 3
OUT_PAD = 128          # lane-dense padded logit width
BN_EPS = 1e-5


# --------------------------------------------------------------------------- #
# Kernel
# --------------------------------------------------------------------------- #
def _acute_kernel(img_ref, tab_ref,
                  wb_ref, bb_ref, w1_ref, b1_ref, w2_ref, b2_ref,
                  wh_ref, bh_ref, out_ref):
    # ---- image branch: GAP (1/HW folded into wb) + Linear(C,512) + ReLU ----
    pooled = jnp.sum(img_ref[...].astype(jnp.float32), axis=-1)          # (TB, C)
    feat = jnp.dot(pooled, wb_ref[...],
                   preferred_element_type=jnp.float32) + bb_ref[...]     # (TB, 512)
    feat = jnp.maximum(feat, 0.0)

    # ---- tabular branch: mlp2 + fc2 (BN folded into the linears, dropout=id) ----
    h = jnp.dot(tab_ref[...], w1_ref[...],
                preferred_element_type=jnp.float32) + b1_ref[...]        # (TB, 512)
    h = jnp.maximum(h, 0.0)
    t = jnp.dot(h, w2_ref[...],
                preferred_element_type=jnp.float32) + b2_ref[...]        # (TB, 128)
    t = jnp.maximum(t, 0.0)

    # ---- fused logit heads (0.5 blend folded into wh/bh), lane-dense output ----
    cat = jnp.concatenate([feat, t], axis=-1)                            # (TB, 640)
    out_ref[...] = (jnp.dot(cat, wh_ref[...],
                            preferred_element_type=jnp.float32)
                    + bh_ref[...]).astype(out_ref.dtype)


# --------------------------------------------------------------------------- #
# Parameters
# --------------------------------------------------------------------------- #
def init_raw_params(key, in_channels):
    """Deterministic parameter init (PyTorch-default-like BN stats)."""
    ks = jax.random.split(key, 5)
    f32 = jnp.float32

    def w(k, shape, fan_in):
        return jax.random.normal(k, shape, f32) / jnp.sqrt(f32(fan_in))

    params = dict(
        # backbone stand-in Linear(C -> 512)
        wb=w(ks[0], (in_channels, HIDDEN), in_channels),
        bb=jnp.zeros((1, HIDDEN), f32),
        # fc1: Linear(512 -> 3)
        wfc1=w(ks[1], (HIDDEN, NUM_CLASSES), HIDDEN),
        bfc1=jnp.zeros((1, NUM_CLASSES), f32),
        # mlp2: Linear(25 -> 512) + BN(512)
        w1=w(ks[2], (TAB_DIM, HIDDEN), TAB_DIM),
        b1=jnp.zeros((1, HIDDEN), f32),
        g1=jnp.ones((1, HIDDEN), f32), bt1=jnp.zeros((1, HIDDEN), f32),
        m1=jnp.zeros((1, HIDDEN), f32), v1=jnp.ones((1, HIDDEN), f32),
        # mlp2: Linear(512 -> 128) ; fc2 BN(128)
        w2=w(ks[3], (HIDDEN, TAB_HID), HIDDEN),
        b2=jnp.zeros((1, TAB_HID), f32),
        g2=jnp.ones((1, TAB_HID), f32), bt2=jnp.zeros((1, TAB_HID), f32),
        m2=jnp.zeros((1, TAB_HID), f32), v2=jnp.ones((1, TAB_HID), f32),
        # fc2: Linear(128 -> 3)
        w3=w(ks[4], (TAB_HID, NUM_CLASSES), TAB_HID),
        b3=jnp.zeros((1, NUM_CLASSES), f32),
    )
    return params


def prepare_params(p, H, W):
    """Fold eval-mode BN, the 0.5 blend, and 1/(H*W) into the linear weights;
    pad tabular-K to 128 lanes; fuse + pad the two logit heads to 128 lanes."""
    HW = H * W
    f32 = jnp.float32

    wb = p["wb"] / f32(HW)                 # fold GAP's 1/(H*W) into the stand-in linear
    bb = p["bb"]

    s1 = p["g1"] * jax.lax.rsqrt(p["v1"] + BN_EPS)      # BN(512) into Linear(25,512)
    w1 = p["w1"] * s1
    b1 = (p["b1"] - p["m1"]) * s1 + p["bt1"]
    w1 = jnp.zeros((TAB_PAD, HIDDEN), f32).at[:TAB_DIM, :].set(w1)   # lane-dense K

    s2 = p["g2"] * jax.lax.rsqrt(p["v2"] + BN_EPS)      # BN(128) into Linear(512,128)
    w2 = p["w2"] * s2
    b2 = (p["b2"] - p["m2"]) * s2 + p["bt2"]

    # fused 0.5-blended, 128-lane-padded logit heads: [feat(512) | t(128)] @ wh + bh
    wh = jnp.zeros((HIDDEN + TAB_HID, OUT_PAD), f32)
    wh = wh.at[:HIDDEN, :NUM_CLASSES].set(0.5 * p["wfc1"])
    wh = wh.at[HIDDEN:, :NUM_CLASSES].set(0.5 * p["w3"])
    bh = jnp.zeros((1, OUT_PAD), f32).at[:, :NUM_CLASSES].set(
        0.5 * (p["bfc1"] + p["b3"]))

    return (wb, bb, w1, b1, w2, b2, wh, bh)


# --------------------------------------------------------------------------- #
# Wrapper
# --------------------------------------------------------------------------- #
def _round_up(x, m):
    return ((x + m - 1) // m) * m


def acute_forward_add(img_nchw, tabular, prepared_params):
    B, C, H, W = img_nchw.shape
    HW = H * W
    CHW = C * HW

    weights = prepared_params
    weight_bytes = sum(int(w.size) * w.dtype.itemsize for w in weights)

    # Image dominates bytes moved -> bf16 DMA; pooling / accumulation in f32 in-kernel.
    img = img_nchw.reshape(B, C, HW).astype(jnp.bfloat16)
    tab = jnp.zeros((B, TAB_PAD), jnp.float32).at[:, :TAB_DIM].set(
        tabular.astype(jnp.float32))

    # ---- generation-aware tile & VMEM budgets ----
    try:
        vmem_cap = int(pltpu.get_tpu_info().vmem_capacity_bytes)
    except Exception:
        vmem_cap = 64 << 20                       # conservative (v7x-sized) default
    if vmem_cap <= (64 << 20):                    # v7x: 64 MiB VMEM per TensorCore
        img_tile_budget, tile_cap, vmem_ceiling = 6 << 20, 512, 44 << 20
    else:                                         # v5e / v6e: 128 MiB VMEM
        img_tile_budget, tile_cap, vmem_ceiling = 20 << 20, 2048, 96 << 20

    # Biggest batch tile (multiple of 16 -> packed bf16 sublanes) within the budget.
    tile_from_budget = (img_tile_budget // max(CHW * 2, 1)) // 16 * 16
    tile_b = max(16, min(tile_cap, max(tile_from_budget, 16), _round_up(B, 16)))
    grid = (pl.cdiv(B, tile_b),)                  # ragged last tile masked; no HBM pad

    img_tile_bytes = tile_b * CHW * 2
    act_bytes = (2 * img_tile_bytes               # double-buffered bf16 image tiles
                 + tile_b * CHW * 4               # in-kernel f32 copy for the reduce
                 + 2 * tile_b * (TAB_PAD + OUT_PAD) * 4
                 + tile_b * (3 * HIDDEN + 2 * TAB_HID) * 4)
    vmem_limit = int(min(vmem_ceiling,
                         max(32 << 20, act_bytes + 2 * weight_bytes + (8 << 20))))

    flops = B * (C * HW + 2 * (C * HIDDEN + TAB_PAD * HIDDEN
                               + HIDDEN * TAB_HID + (HIDDEN + TAB_HID) * OUT_PAD))
    bytes_accessed = (B * CHW * 2 + B * TAB_PAD * 4 + weight_bytes + B * OUT_PAD * 4)

    img_spec = pl.BlockSpec((tile_b, C, HW), lambda i: (i, 0, 0))
    tab_spec = pl.BlockSpec((tile_b, TAB_PAD), lambda i: (i, 0))
    out_spec = pl.BlockSpec((tile_b, OUT_PAD), lambda i: (i, 0))

    def _run(single_buffer_weights):
        def wspec(arr):
            if single_buffer_weights:
                # constant index_map -> fetched once; single buffer halves its VMEM
                return pl.BlockSpec(arr.shape, lambda i: (0, 0),
                                    pipeline_mode=pl.Buffered(buffer_count=1))
            return pl.BlockSpec(arr.shape, lambda i: (0, 0))

        return pl.pallas_call(
            _acute_kernel,
            out_shape=jax.ShapeDtypeStruct((B, OUT_PAD), jnp.float32),
            grid=grid,
            in_specs=[img_spec, tab_spec] + [wspec(w) for w in weights],
            out_specs=out_spec,
            compiler_params=pltpu.CompilerParams(
                dimension_semantics=("parallel",),
                vmem_limit_bytes=vmem_limit),
            cost_estimate=pl.CostEstimate(
                flops=flops, transcendentals=0, bytes_accessed=bytes_accessed),
        )(img, tab, *weights)

    try:
        out_padded = _run(True)        # weights VMEM-resident, single-buffered
    except Exception:                   # fallback for jax versions w/o Buffered(1)
        out_padded = _run(False)

    return out_padded[:, :NUM_CLASSES]


# --------------------------------------------------------------------------- #
# Pure-JAX reference (original, unfolded semantics) for correctness check
# --------------------------------------------------------------------------- #
def _reference_forward_add(img, tab, p, H, W):
    B, C = img.shape[0], img.shape[1]
    pooled = jnp.mean(img.reshape(B, C, H * W), axis=-1)
    img_feat = jnp.maximum(pooled @ p["wb"] + p["bb"], 0.0)
    img_logit = img_feat @ p["wfc1"] + p["bfc1"]

    h = tab @ p["w1"] + p["b1"]
    h = (h - p["m1"]) * jax.lax.rsqrt(p["v1"] + BN_EPS) * p["g1"] + p["bt1"]
    h = jnp.maximum(h, 0.0)
    tf = h @ p["w2"] + p["b2"]
    t = (tf - p["m2"]) * jax.lax.rsqrt(p["v2"] + BN_EPS) * p["g2"] + p["bt2"]
    t = jnp.maximum(t, 0.0)
    tab_logit = t @ p["w3"] + p["b3"]
    return 0.5 * img_logit + 0.5 * tab_logit


if __name__ == "__main__":
    key = jax.random.PRNGKey(0)
    k_img, k_tab, k_par = jax.random.split(key, 3)

    B, C, H, W = 2, 4, 16, 16
    img = jax.random.normal(k_img, (B, C, H, W), jnp.float32)
    tabular = jax.random.normal(k_tab, (B, TAB_DIM), jnp.float32)

    raw_params = init_raw_params(k_par, C)
    params = prepare_params(raw_params, H, W)

    out = acute_forward_add(img, tabular, params)
    out = jax.block_until_ready(out)

    ref = _reference_forward_add(img, tabular, raw_params, H, W)

    assert out.shape == (B, NUM_CLASSES), out.shape
    assert out.dtype == jnp.float32
    assert bool(jnp.all(jnp.isfinite(out)))
    max_err = float(jnp.max(jnp.abs(out - ref)))
    assert max_err < 5e-2, f"mismatch vs reference: {max_err}"
    print("KERNEL_OK")
</pallas_src>

<mosaic_0001>
module attributes {stable_mosaic.version = 11 : i64} {
  func.func @_acute_kernel(%arg0: i32, %arg1: memref<16x4x256xbf16, #tpu.memory_space<vmem>>, %arg2: memref<16x128xf32, #tpu.memory_space<vmem>>, %arg3: memref<4x512xf32, #tpu.memory_space<vmem>>, %arg4: memref<1x512xf32, #tpu.memory_space<vmem>>, %arg5: memref<128x512xf32, #tpu.memory_space<vmem>>, %arg6: memref<1x512xf32, #tpu.memory_space<vmem>>, %arg7: memref<512x128xf32, #tpu.memory_space<vmem>>, %arg8: memref<1x128xf32, #tpu.memory_space<vmem>>, %arg9: memref<640x128xf32, #tpu.memory_space<vmem>>, %arg10: memref<1x128xf32, #tpu.memory_space<vmem>>, %arg11: memref<16x128xf32, #tpu.memory_space<vmem>>) attributes {dimension_semantics = [#tpu.dimension_semantics<parallel>], iteration_bounds = array<i64: 1>, scalar_prefetch = 0 : i64, scratch_operands = 0 : i64, tpu.core_type = #tpu.core_type<tc>, window_params = [{transform_indices = @transform_0, window_bounds = array<i64: 16, 4, 256>}, {transform_indices = @transform_1, window_bounds = array<i64: 16, 128>}, {pipeline_mode = #tpu.pipeline_mode<synchronous>, transform_indices = @transform_2, window_bounds = array<i64: 4, 512>}, {pipeline_mode = #tpu.pipeline_mode<synchronous>, transform_indices = @transform_3, window_bounds = array<i64: 1, 512>}, {pipeline_mode = #tpu.pipeline_mode<synchronous>, transform_indices = @transform_4, window_bounds = array<i64: 128, 512>}, {pipeline_mode = #tpu.pipeline_mode<synchronous>, transform_indices = @transform_5, window_bounds = array<i64: 1, 512>}, {pipeline_mode = #tpu.pipeline_mode<synchronous>, transform_indices = @transform_6, window_bounds = array<i64: 512, 128>}, {pipeline_mode = #tpu.pipeline_mode<synchronous>, transform_indices = @transform_7, window_bounds = array<i64: 1, 128>}, {pipeline_mode = #tpu.pipeline_mode<synchronous>, transform_indices = @transform_8, window_bounds = array<i64: 640, 128>}, {pipeline_mode = #tpu.pipeline_mode<synchronous>, transform_indices = @transform_9, window_bounds = array<i64: 1, 128>}, {transform_indices = @transform_10, window_bounds = array<i64: 16, 128>}]} {
    %c0 = arith.constant 0 : index
    %c0_0 = arith.constant 0 : index
    %c0_1 = arith.constant 0 : index
    %0 = vector.load %arg1[%c0, %c0_0, %c0_1] : memref<16x4x256xbf16, #tpu.memory_space<vmem>>, vector<16x4x256xbf16>
    %1 = arith.extf %0 : vector<16x4x256xbf16> to vector<16x4x256xf32>
    %cst = arith.constant dense<0.000000e+00> : vector<16x4xf32>
    %2 = vector.multi_reduction <add>, %1, %cst [2] : vector<16x4x256xf32> to vector<16x4xf32>
    %c0_2 = arith.constant 0 : index
    %c0_3 = arith.constant 0 : index
    %3 = vector.load %arg3[%c0_2, %c0_3] : memref<4x512xf32, #tpu.memory_space<vmem>>, vector<4x512xf32>
    %cst_4 = arith.constant dense<0.000000e+00> : vector<16x512xf32>
    %4 = tpu.matmul %2, %3, %cst_4 {dimension_numbers = #tpu.dot_dimension_numbers<[1], [0], [0], [1], [0, 0, 1, 1], [], []>} : vector<16x4xf32>, vector<4x512xf32>, vector<16x512xf32> -> vector<16x512xf32>
    %c0_5 = arith.constant 0 : index
    %c0_6 = arith.constant 0 : index
    %5 = vector.load %arg4[%c0_5, %c0_6] : memref<1x512xf32, #tpu.memory_space<vmem>>, vector<1x512xf32>
    %6 = vector.broadcast %5 : vector<1x512xf32> to vector<16x512xf32>
    %7 = arith.addf %4, %6 : vector<16x512xf32>
    %cst_7 = arith.constant 0.000000e+00 : f32
    %8 = vector.broadcast %cst_7 : f32 to vector<16x512xf32>
    %9 = arith.maximumf %7, %8 : vector<16x512xf32>
    %c0_8 = arith.constant 0 : index
    %c0_9 = arith.constant 0 : index
    %10 = vector.load %arg2[%c0_8, %c0_9] : memref<16x128xf32, #tpu.memory_space<vmem>>, vector<16x128xf32>
    %c0_10 = arith.constant 0 : index
    %c0_11 = arith.constant 0 : index
    %11 = vector.load %arg5[%c0_10, %c0_11] : memref<128x512xf32, #tpu.memory_space<vmem>>, vector<128x512xf32>
    %cst_12 = arith.constant dense<0.000000e+00> : vector<16x512xf32>
    %12 = tpu.matmul %10, %11, %cst_12 {dimension_numbers = #tpu.dot_dimension_numbers<[1], [0], [0], [1], [0, 0, 1, 1], [], []>} : vector<16x128xf32>, vector<128x512xf32>, vector<16x512xf32> -> vector<16x512xf32>
    %c0_13 = arith.constant 0 : index
    %c0_14 = arith.constant 0 : index
    %13 = vector.load %arg6[%c0_13, %c0_14] : memref<1x512xf32, #tpu.memory_space<vmem>>, vector<1x512xf32>
    %14 = vector.broadcast %13 : vector<1x512xf32> to vector<16x512xf32>
    %15 = arith.addf %12, %14 : vector<16x512xf32>
    %cst_15 = arith.constant 0.000000e+00 : f32
    %16 = vector.broadcast %cst_15 : f32 to vector<16x512xf32>
    %17 = arith.maximumf %15, %16 : vector<16x512xf32>
    %c0_16 = arith.constant 0 : index
    %c0_17 = arith.constant 0 : index
    %18 = vector.load %arg7[%c0_16, %c0_17] : memref<512x128xf32, #tpu.memory_space<vmem>>, vector<512x128xf32>
    %cst_18 = arith.constant dense<0.000000e+00> : vector<16x128xf32>
    %19 = tpu.matmul %17, %18, %cst_18 {dimension_numbers = #tpu.dot_dimension_numbers<[1], [0], [0], [1], [0, 0, 1, 1], [], []>} : vector<16x512xf32>, vector<512x128xf32>, vector<16x128xf32> -> vector<16x128xf32>
    %c0_19 = arith.constant 0 : index
    %c0_20 = arith.constant 0 : index
    %20 = vector.load %arg8[%c0_19, %c0_20] : memref<1x128xf32, #tpu.memory_space<vmem>>, vector<1x128xf32>
    %21 = vector.broadcast %20 : vector<1x128xf32> to vector<16x128xf32>
    %22 = arith.addf %19, %21 : vector<16x128xf32>
    %cst_21 = arith.constant 0.000000e+00 : f32
    %23 = vector.broadcast %cst_21 : f32 to vector<16x128xf32>
    %24 = arith.maximumf %22, %23 : vector<16x128xf32>
    %25 = tpu.concatenate %9, %24 in 1 : vector<16x512xf32>, vector<16x128xf32> -> vector<16x640xf32>
    %c0_22 = arith.constant 0 : index
    %c0_23 = arith.constant 0 : index
    %26 = vector.load %arg9[%c0_22, %c0_23] : memref<640x128xf32, #tpu.memory_space<vmem>>, vector<640x128xf32>
    %cst_24 = arith.constant dense<0.000000e+00> : vector<16x128xf32>
    %27 = tpu.matmul %25, %26, %cst_24 {dimension_numbers = #tpu.dot_dimension_numbers<[1], [0], [0], [1], [0, 0, 1, 1], [], []>} : vector<16x640xf32>, vector<640x128xf32>, vector<16x128xf32> -> vector<16x128xf32>
    %c0_25 = arith.constant 0 : index
    %c0_26 = arith.constant 0 : index
    %28 = vector.load %arg10[%c0_25, %c0_26] : memref<1x128xf32, #tpu.memory_space<vmem>>, vector<1x128xf32>
    %29 = vector.broadcast %28 : vector<1x128xf32> to vector<16x128xf32>
    %30 = arith.addf %27, %29 : vector<16x128xf32>
    %c0_27 = arith.constant 0 : index
    %c0_28 = arith.constant 0 : index
    %31 = vector.load %arg11[%c0_27, %c0_28] : memref<16x128xf32, #tpu.memory_space<vmem>>, vector<16x128xf32>
    tpu.vector_store %arg11[%c0_27, %c0_28], %30 {strides = array<i32>} : memref<16x128xf32, #tpu.memory_space<vmem>>, vector<16x128xf32>,
    return
  }
  func.func @transform_0(%arg0: i32) -> (i32, i32, i32) {
    %c0_i32 = arith.constant 0 : i32
    %c0_i32_0 = arith.constant 0 : i32
    %c0_i32_1 = arith.constant 0 : i32
    return %arg0, %c0_i32, %c0_i32_0 : i32, i32, i32
  }
  func.func @transform_1(%arg0: i32) -> (i32, i32) {
    %c0_i32 = arith.constant 0 : i32
    %c0_i32_0 = arith.constant 0 : i32
    return %arg0, %c0_i32 : i32, i32
  }
  func.func @transform_2(%arg0: i32) -> (i32, i32) {
    %c0_i32 = arith.constant 0 : i32
    %c0_i32_0 = arith.constant 0 : i32
    %c0_i32_1 = arith.constant 0 : i32
    return %c0_i32, %c0_i32_0 : i32, i32
  }
  func.func @transform_3(%arg0: i32) -> (i32, i32) {
    %c0_i32 = arith.constant 0 : i32
    %c0_i32_0 = arith.constant 0 : i32
    %c0_i32_1 = arith.constant 0 : i32
    return %c0_i32, %c0_i32_0 : i32, i32
  }
  func.func @transform_4(%arg0: i32) -> (i32, i32) {
    %c0_i32 = arith.constant 0 : i32
    %c0_i32_0 = arith.constant 0 : i32
    %c0_i32_1 = arith.constant 0 : i32
    return %c0_i32, %c0_i32_0 : i32, i32
  }
  func.func @transform_5(%arg0: i32) -> (i32, i32) {
    %c0_i32 = arith.constant 0 : i32
    %c0_i32_0 = arith.constant 0 : i32
    %c0_i32_1 = arith.constant 0 : i32
    return %c0_i32, %c0_i32_0 : i32, i32
  }
  func.func @transform_6(%arg0: i32) -> (i32, i32) {
    %c0_i32 = arith.constant 0 : i32
    %c0_i32_0 = arith.constant 0 : i32
    %c0_i32_1 = arith.constant 0 : i32
    return %c0_i32, %c0_i32_0 : i32, i32
  }
  func.func @transform_7(%arg0: i32) -> (i32, i32) {
    %c0_i32 = arith.constant 0 : i32
    %c0_i32_0 = arith.constant 0 : i32
    %c0_i32_1 = arith.constant 0 : i32
    return %c0_i32, %c0_i32_0 : i32, i32
  }
  func.func @transform_8(%arg0: i32) -> (i32, i32) {
    %c0_i32 = arith.constant 0 : i32
    %c0_i32_0 = arith.constant 0 : i32
    %c0_i32_1 = arith.constant 0 : i32
    return %c0_i32, %c0_i32_0 : i32, i32
  }
  func.func @transform_9(%arg0: i32) -> (i32, i32) {
    %c0_i32 = arith.constant 0 : i32
    %c0_i32_0 = arith.constant 0 : i32
    %c0_i32_1 = arith.constant 0 : i32
    return %c0_i32, %c0_i32_0 : i32, i32
  }
  func.func @transform_10(%arg0: i32) -> (i32, i32) {
    %c0_i32 = arith.constant 0 : i32
    %c0_i32_0 = arith.constant 0 : i32
    return %arg0, %c0_i32 : i32, i32
  }
}

module attributes {stable_mosaic.version = 11 : i64} {
  func.func @_acute_kernel(%arg0: i32, %arg1: memref<16x4x256xbf16, #tpu.memory_space<vmem>>, %arg2: memref<16x128xf32, #tpu.memory_space<vmem>>, %arg3: memref<4x512xf32, #tpu.memory_space<vmem>>, %arg4: memref<1x512xf32, #tpu.memory_space<vmem>>, %arg5: memref<128x512xf32, #tpu.memory_space<vmem>>, %arg6: memref<1x512xf32, #tpu.memory_space<vmem>>, %arg7: memref<512x128xf32, #tpu.memory_space<vmem>>, %arg8: memref<1x128xf32, #tpu.memory_space<vmem>>, %arg9: memref<640x128xf32, #tpu.memory_space<vmem>>, %arg10: memref<1x128xf32, #tpu.memory_space<vmem>>, %arg11: memref<16x128xf32, #tpu.memory_space<vmem>>) attributes {dimension_semantics = [#tpu.dimension_semantics<parallel>], iteration_bounds = array<i64: 1>, scalar_prefetch = 0 : i64, scratch_operands = 0 : i64, tpu.core_type = #tpu.core_type<tc>, window_params = [{transform_indices = @transform_0, window_bounds = array<i64: 16, 4, 256>}, {transform_indices = @transform_1, window_bounds = array<i64: 16, 128>}, {pipeline_mode = #tpu.pipeline_mode<synchronous>, transform_indices = @transform_2, window_bounds = array<i64: 4, 512>}, {pipeline_mode = #tpu.pipeline_mode<synchronous>, transform_indices = @transform_3, window_bounds = array<i64: 1, 512>}, {pipeline_mode = #tpu.pipeline_mode<synchronous>, transform_indices = @transform_4, window_bounds = array<i64: 128, 512>}, {pipeline_mode = #tpu.pipeline_mode<synchronous>, transform_indices = @transform_5, window_bounds = array<i64: 1, 512>}, {pipeline_mode = #tpu.pipeline_mode<synchronous>, transform_indices = @transform_6, window_bounds = array<i64: 512, 128>}, {pipeline_mode = #tpu.pipeline_mode<synchronous>, transform_indices = @transform_7, window_bounds = array<i64: 1, 128>}, {pipeline_mode = #tpu.pipeline_mode<synchronous>, transform_indices = @transform_8, window_bounds = array<i64: 640, 128>}, {pipeline_mode = #tpu.pipeline_mode<synchronous>, transform_indices = @transform_9, window_bounds = array<i64: 1, 128>}, {transform_indices = @transform_10, window_bounds = array<i64: 16, 128>}]} {
    %c0 = arith.constant 0 : index
    %c0_0 = arith.constant 0 : index
    %c0_1 = arith.constant 0 : index
    %0 = vector.load %arg1[%c0, %c0_0, %c0_1] : memref<16x4x256xbf16, #tpu.memory_space<vmem>>, vector<16x4x256xbf16>
    %1 = arith.extf %0 : vector<16x4x256xbf16> to vector<16x4x256xf32>
    %cst = arith.constant dense<0.000000e+00> : vector<16x4xf32>
    %2 = vector.multi_reduction <add>, %1, %cst [2] : vector<16x4x256xf32> to vector<16x4xf32>
    %c0_2 = arith.constant 0 : index
    %c0_3 = arith.constant 0 : index
    %3 = vector.load %arg3[%c0_2, %c0_3] : memref<4x512xf32, #tpu.memory_space<vmem>>, vector<4x512xf32>
    %cst_4 = arith.constant dense<0.000000e+00> : vector<16x512xf32>
    %4 = tpu.matmul %2, %3, %cst_4 {dimension_numbers = #tpu.dot_dimension_numbers<[1], [0], [0], [1], [0, 0, 1, 1], [], []>} : vector<16x4xf32>, vector<4x512xf32>, vector<16x512xf32> -> vector<16x512xf32>
    %c0_5 = arith.constant 0 : index
    %c0_6 = arith.constant 0 : index
    %5 = vector.load %arg4[%c0_5, %c0_6] : memref<1x512xf32, #tpu.memory_space<vmem>>, vector<1x512xf32>
    %6 = vector.broadcast %5 : vector<1x512xf32> to vector<16x512xf32>
    %7 = arith.addf %4, %6 : vector<16x512xf32>
    %cst_7 = arith.constant 0.000000e+00 : f32
    %8 = vector.broadcast %cst_7 : f32 to vector<16x512xf32>
    %9 = arith.maximumf %7, %8 : vector<16x512xf32>
    %c0_8 = arith.constant 0 : index
    %c0_9 = arith.constant 0 : index
    %10 = vector.load %arg2[%c0_8, %c0_9] : memref<16x128xf32, #tpu.memory_space<vmem>>, vector<16x128xf32>
    %c0_10 = arith.constant 0 : index
    %c0_11 = arith.constant 0 : index
    %11 = vector.load %arg5[%c0_10, %c0_11] : memref<128x512xf32, #tpu.memory_space<vmem>>, vector<128x512xf32>
    %cst_12 = arith.constant dense<0.000000e+00> : vector<16x512xf32>
    %12 = tpu.matmul %10, %11, %cst_12 {dimension_numbers = #tpu.dot_dimension_numbers<[1], [0], [0], [1], [0, 0, 1, 1], [], []>} : vector<16x128xf32>, vector<128x512xf32>, vector<16x512xf32> -> vector<16x512xf32>
    %c0_13 = arith.constant 0 : index
    %c0_14 = arith.constant 0 : index
    %13 = vector.load %arg6[%c0_13, %c0_14] : memref<1x512xf32, #tpu.memory_space<vmem>>, vector<1x512xf32>
    %14 = vector.broadcast %13 : vector<1x512xf32> to vector<16x512xf32>
    %15 = arith.addf %12, %14 : vector<16x512xf32>
    %cst_15 = arith.constant 0.000000e+00 : f32
    %16 = vector.broadcast %cst_15 : f32 to vector<16x512xf32>
    %17 = arith.maximumf %15, %16 : vector<16x512xf32>
    %c0_16 = arith.constant 0 : index
    %c0_17 = arith.constant 0 : index
    %18 = vector.load %arg7[%c0_16, %c0_17] : memref<512x128xf32, #tpu.memory_space<vmem>>, vector<512x128xf32>
    %cst_18 = arith.constant dense<0.000000e+00> : vector<16x128xf32>
    %19 = tpu.matmul %17, %18, %cst_18 {dimension_numbers = #tpu.dot_dimension_numbers<[1], [0], [0], [1], [0, 0, 1, 1], [], []>} : vector<16x512xf32>, vector<512x128xf32>, vector<16x128xf32> -> vector<16x128xf32>
    %c0_19 = arith.constant 0 : index
    %c0_20 = arith.constant 0 : index
    %20 = vector.load %arg8[%c0_19, %c0_20] : memref<1x128xf32, #tpu.memory_space<vmem>>, vector<1x128xf32>
    %21 = vector.broadcast %20 : vector<1x128xf32> to vector<16x128xf32>
    %22 = arith.addf %19, %21 : vector<16x128xf32>
    %cst_21 = arith.constant 0.000000e+00 : f32
    %23 = vector.broadcast %cst_21 : f32 to vector<16x128xf32>
    %24 = arith.maximumf %22, %23 : vector<16x128xf32>
    %25 = tpu.concatenate %9, %24 in 1 : vector<16x512xf32>, vector<16x128xf32> -> vector<16x640xf32>
    %c0_22 = arith.constant 0 : index
    %c0_23 = arith.constant 0 : index
    %26 = vector.load %arg9[%c0_22, %c0_23] : memref<640x128xf32, #tpu.memory_space<vmem>>, vector<640x128xf32>
    %cst_24 = arith.constant dense<0.000000e+00> : vector<16x128xf32>
    %27 = tpu.matmul %25, %26, %cst_24 {dimension_numbers = #tpu.dot_dimension_numbers<[1], [0], [0], [1], [0, 0, 1, 1], [], []>} : vector<16x640xf32>, vector<640x128xf32>, vector<16x128xf32> -> vector<16x128xf32>
    %c0_25 = arith.constant 0 : index
    %c0_26 = arith.constant 0 : index
    %28 = vector.load %arg10[%c0_25, %c0_26] : memref<1x128xf32, #tpu.memory_space<vmem>>, vector<1x128xf32>
    %29 = vector.broadcast %28 : vector<1x128xf32> to vector<16x128xf32>
    %30 = arith.addf %27, %29 : vector<16x128xf32>
    %c0_27 = arith.constant 0 : index
    %c0_28 = arith.constant 0 : index
    %31 = vector.load %arg11[%c0_27, %c0_28] : memref<16x128xf32, #tpu.memory_space<vmem>>, vector<16x128xf32>
    tpu.vector_store %arg11[%c0_27, %c0_28], %30 {strides = array<i32>} : memref<16x128xf32, #tpu.memory_space<vmem>>, vector<16x128xf32>,
    return
  }
  func.func @transform_0(%arg0: i32) -> (i32, i32, i32) {
    %c0_i32 = arith.constant 0 : i32
    %c0_i32_0 = arith.constant 0 : i32
    %c0_i32_1 = arith.constant 0 : i32
    return %arg0, %c0_i32, %c0_i32_0 : i32, i32, i32
  }
  func.func @transform_1(%arg0: i32) -> (i32, i32) {
    %c0_i32 = arith.constant 0 : i32
    %c0_i32_0 = arith.constant 0 : i32
    return %arg0, %c0_i32 : i32, i32
  }
  func.func @transform_2(%arg0: i32) -> (i32, i32) {
    %c0_i32 = arith.constant 0 : i32
    %c0_i32_0 = arith.constant 0 : i32
    %c0_i32_1 = arith.constant 0 : i32
    return %c0_i32, %c0_i32_0 : i32, i32
  }
  func.func @transform_3(%arg0: i32) -> (i32, i32) {
    %c0_i32 = arith.constant 0 : i32
    %c0_i32_0 = arith.constant 0 : i32
    %c0_i32_1 = arith.constant 0 : i32
    return %c0_i32, %c0_i32_0 : i32, i32
  }
  func.func @transform_4(%arg0: i32) -> (i32, i32) {
    %c0_i32 = arith.constant 0 : i32
    %c0_i32_0 = arith.constant 0 : i32
    %c0_i32_1 = arith.constant 0 : i32
    return %c0_i32, %c0_i32_0 : i32, i32
  }
  func.func @transform_5(%arg0: i32) -> (i32, i32) {
    %c0_i32 = arith.constant 0 : i32
    %c0_i32_0 = arith.constant 0 : i32
    %c0_i32_1 = arith.constant 0 : i32
    return %c0_i32, %c0_i32_0 : i32, i32
  }
  func.func @transform_6(%arg0: i32) -> (i32, i32) {
    %c0_i32 = arith.constant 0 : i32
    %c0_i32_0 = arith.constant 0 : i32
    %c0_i32_1 = arith.constant 0 : i32
    return %c0_i32, %c0_i32_0 : i32, i32
  }
  func.func @transform_7(%arg0: i32) -> (i32, i32) {
    %c0_i32 = arith.constant 0 : i32
    %c0_i32_0 = arith.constant 0 : i32
    %c0_i32_1 = arith.constant 0 : i32
    return %c0_i32, %c0_i32_0 : i32, i32
  }
  func.func @transform_8(%arg0: i32) -> (i32, i32) {
    %c0_i32 = arith.constant 0 : i32
    %c0_i32_0 = arith.constant 0 : i32
    %c0_i32_1 = arith.constant 0 : i32
    return %c0_i32, %c0_i32_0 : i32, i32
  }
  func.func @transform_9(%arg0: i32) -> (i32, i32) {
    %c0_i32 = arith.constant 0 : i32
    %c0_i32_0 = arith.constant 0 : i32
    %c0_i32_1 = arith.constant 0 : i32
    return %c0_i32, %c0_i32_0 : i32, i32
  }
  func.func @transform_10(%arg0: i32) -> (i32, i32) {
    %c0_i32 = arith.constant 0 : i32
    %c0_i32_0 = arith.constant 0 : i32
    return %arg0, %c0_i32 : i32, i32
  }
}

</mosaic_0001>

<bundles_post_ra>
// kernel: tpu_custom_call.1
= control target key start
LH: loop header
LB: loop body
LE: loop exit
PB: predicated region body
PF: predicated region fallthrough
CT: control target
= control target key end

     0   :  { %15 = vsyncpa [#allocation3], 0  ;;  %s2040_s0 = inlined_call_operand.hbm [shape: bf16[2,4,256], index: 0, kind: input, shape index: {}]   ;;  %s2041_s1 = inlined_call_operand.hbm [shape: f32[2,128], index: 1, kind: input, shape index: {}]   ;;  %s2042_s2 = inlined_call_operand.hbm [shape: f32[4,512], index: 2, kind: input, shape index: {}]   ;;  %s2043_s3 = inlined_call_operand.vmem [shape: f32[1,512], index: 3, kind: input, shape index: {}]   ;;  %s2044_s4 = inlined_call_operand.hbm [shape: f32[128,512], index: 4, kind: input, shape index: {}]   ;;  %s2045_s5 = inlined_call_operand.vmem [shape: f32[1,512], index: 5, kind: input, shape index: {}]   ;;  %s2046_s6 = inlined_call_operand.hbm [shape: f32[512,128], index: 6, kind: input, shape index: {}]   ;;  %s2047_s7 = inlined_call_operand.vmem [shape: f32[1,128], index: 7, kind: input, shape index: {}]   ;;  %s2048_s8 = inlined_call_operand.hbm [shape: f32[640,128], index: 8, kind: input, shape index: {}]   ;;  %s2049_s9 = inlined_call_operand.vmem [shape: f32[1,128], index: 9, kind: input, shape index: {}]   ;;  %s2050_s10 = inlined_call_operand.hbm [shape: f32[2,128], index: 10, kind: output, shape index: {}]  }
   0x1   :  { %16 = vsyncpa [#allocation6], 0 }
   0x2   :  { %17 = vsyncpa [#allocation9], 0 }
   0x3   :  { %18 = vsyncpa [#allocation12], 0 }
   0x4   :  { %19 = vsyncpa [#allocation4], 0 }
   0x5   :  { %24 = vsyncadd [#allocation3], 896  ;;  %s1811_s13 = smov [#allocation2]  }
   0x6   :  { %s25_s14 = sshll.u32 %s1811_s13, 4  ;;  %s26_s14 = int_to_ptr.vmem [resolvable:$true] %s25_s14 }
   0x7   :  { %s1669_s15 = scalar_lea.vmem %s26_s14, 128  ;;  %s1673_s16 = scalar_lea.vmem %s26_s14, 1024 }
   0x8   :  { %p1670_p0 = scmp.ne.s32.totalorder %s26_s14, %s1669_s15  ;;  %p1674_p1 = scmp.lt.s32.totalorder %s26_s14, %s26_s14 }
   0x9   :  { %p1675_p2 = scmp.lt.s32.totalorder %s1673_s16, %s1669_s15 }
   0xb   :  { %p1676_p3 = por %p1675_p2, %p1674_p1 }
   0xd   :  { %p1677_p4 = pnand %p1676_p3, %p1670_p0 }
   0xf   :  { %1680 = shalt.err (!%p1677_p4)
}
  0x10   :  { %s1812_s17 = smov 64   ;;  %s1813_s18 = smov 4  }
  0x11   :  { %31 = dma.hbm_to_vmem [thread:$0]  %s2040_s0, 128, %s26_s14, [#allocation3], %s1812_s17, %s1812_s17, %s1813_s18  }
  0x12   :  { %36 = vsyncadd [#allocation6], 224  ;;  %s1814_s21 = smov [#allocation5]  }
  0x13   :  { %s37_s22 = sshll.u32 %s1814_s21, 4  ;;  %s38_s22 = int_to_ptr.vmem [resolvable:$true] %s37_s22 }
  0x14   :  { %s1689_s23 = scalar_lea.vmem %s38_s22, 32  ;;  %s1693_s24 = scalar_lea.vmem %s38_s22, 256 }
  0x15   :  { %p1690_p5 = scmp.ne.s32.totalorder %s38_s22, %s1689_s23  ;;  %p1694_p6 = scmp.lt.s32.totalorder %s38_s22, %s38_s22 }
  0x16   :  { %p1695_p7 = scmp.lt.s32.totalorder %s1693_s24, %s1689_s23 }
  0x18   :  { %p1696_p8 = por %p1695_p7, %p1694_p6 }
  0x1a   :  { %p1697_p9 = pnand %p1696_p8, %p1690_p5 }
  0x1c   :  { %1700 = shalt.err (!%p1697_p9)
}
  0x1d   :  { %s1815_s25 = smov 32   ;;  %s1816_s26 = smov 2  }
  0x1e   :  { %43 = dma.hbm_to_vmem [thread:$0]  %s2041_s1, 32, %s38_s22, [#allocation6], %s1815_s25, %s1815_s25, %s1816_s26  }
  0x1f   :  { %s1817_s0 = smov [#allocation8]  }
  0x20   :  { %s61_s29 = sshll.u32 %s1817_s0, 4  ;;  %s62_s29 = int_to_ptr.vmem [resolvable:$true] %s61_s29 }
  0x21   :  { %s1709_s30 = scalar_lea.vmem %s62_s29, 8192  ;;  %p1714_p11 = scmp.lt.s32.totalorder %s62_s29, %s62_s29 }
  0x22   :  { %p1710_p10 = scmp.ne.s32.totalorder %s62_s29, %s1709_s30  ;;  %p1715_p12 = scmp.lt.s32.totalorder %s1709_s30, %s1709_s30 }
  0x24   :  { %p1716_p13 = por %p1715_p12, %p1714_p11 }
  0x26   :  { %p1717_p0 = pnand %p1716_p13, %p1710_p10 }
  0x28   :  { %1720 = shalt.err (!%p1717_p0)
}
  0x29   :  { %s1818_s11 = smov 512   ;;  %s1819_s14 = smov [#allocation7]  }
  0x2a   :  { %67 = dma.hbm_to_vmem [thread:$0]  %s2044_s4, 8192, %s62_s29, [#allocation9], %s1818_s11, %s1818_s11, %s1815_s25  }
  0x2b   :  { %s50_s15 = sshll.u32 %s1819_s14, 4  ;;  %s1820_s1 = smov [#allocation10]   ;;  %s51_s15 = int_to_ptr.vmem [resolvable:$true] %s50_s15 }
  0x2c   :  { %s75_s16 = sshll.u32 %s1820_s1, 4  ;;  %s1729_s17 = scalar_lea.vmem %s51_s15, 256  ;;  %s76_s16 = int_to_ptr.vmem [resolvable:$true] %s75_s16 }
  0x2d   :  { %p1730_p1 = scmp.ne.s32.totalorder %s51_s15, %s1729_s17  ;;  %p1734_p2 = scmp.lt.s32.totalorder %s51_s15, %s51_s15 }
  0x2e   :  { %p1735_p3 = scmp.lt.s32.totalorder %s1729_s17, %s1729_s17 }
  0x30   :  { %p1736_p4 = por %p1735_p3, %p1734_p2 }
  0x32   :  { %p1737_p5 = pnand %p1736_p4, %p1730_p1 }
  0x34   :  { %1740 = shalt.err (!%p1737_p5)
}
  0x35   :  { %53 = dma.hbm_to_vmem [thread:$0]  %s2042_s2, 256, %s51_s15, [#allocation6]  }
  0x36   :  { %s1749_s20 = scalar_lea.vmem %s76_s16, 8192  ;;  %p1754_p7 = scmp.lt.s32.totalorder %s76_s16, %s76_s16 }
  0x37   :  { %p1750_p6 = scmp.ne.s32.totalorder %s76_s16, %s1749_s20  ;;  %p1755_p8 = scmp.lt.s32.totalorder %s1749_s20, %s1749_s20 }
  0x39   :  { %p1756_p9 = por %p1755_p8, %p1754_p7 }
  0x3b   :  { %p1757_p10 = pnand %p1756_p9, %p1750_p6 }
  0x3d   :  { %1760 = shalt.err (!%p1757_p10)
}
  0x3e   :  { %s1821_s4 = smov 128   ;;  %s1822_s21 = smov 8  }
  0x3f   :  { %81 = dma.hbm_to_vmem [thread:$0]  %s2046_s6, 8192, %s76_s16, [#allocation9], %s1821_s4, %s1821_s4, %s1822_s21  }
  0x40   :  { %s1823_s24 = smov [#allocation11]  }
  0x41   :  { %s89_s27 = sshll.u32 %s1823_s24, 4  ;;  %s90_s27 = int_to_ptr.vmem [resolvable:$true] %s89_s27 }
  0x42   :  { %s1769_s28 = scalar_lea.vmem %s90_s27, 10240  ;;  %p1774_p12 = scmp.lt.s32.totalorder %s90_s27, %s90_s27 }
  0x43   :  { %p1770_p11 = scmp.ne.s32.totalorder %s90_s27, %s1769_s28  ;;  %p1775_p13 = scmp.lt.s32.totalorder %s1769_s28, %s1769_s28 }
  0x45   :  { %p1776_p0 = por %p1775_p13, %p1774_p12 }
  0x47   :  { %p1777_p1 = pnand %p1776_p0, %p1770_p11 }
  0x49   :  { %1780 = shalt.err (!%p1777_p1)
}
  0x4a   :  { %95 = dma.hbm_to_vmem [thread:$0]  %s2048_s8, 10240, %s90_s27, [#allocation12], %s1821_s4, %s1821_s4, %s1822_s21  }
  0x4b   :  { %1801 = dma.done.wait [#allocation3], 1024  }
  0x4c   :  { %1802 = vsyncadd [#allocation3], 4294966272 }
  0x4d   :  { %1803 = dma.done.wait [#allocation6], 512  }
  0x4e   :  { %1804 = vsyncadd [#allocation6], 4294966784 }
  0x4f   :  { %1805 = dma.done.wait [#allocation9], 16384  }
  0x50   :  { %1806 = vsyncadd [#allocation9], 4294950912 }
  0x51   :  { %1807 = dma.done.wait [#allocation12], 10240  }
  0x52   :  { %1808 = vsyncadd [#allocation12], 4294957056  ;;  %v1824_v0 = vmov 0.0   ;;  %v1432_v1 = vld [vmem:[#allocation2 + $0x8] sm:$0xff]   ;;  %vm196_vm0 = vcmask 1043456   ;;  %v1401_v2 = vld [vmem:[#allocation2] sm:$0xff]  }
  0x53   :  { %735 = vmatprep.mubr.f32.mxu0 %v1824_v0  ;;  %485 = vmatprep.mubr.f32.mxu1 %v1824_v0  ;;  %v1433_v3 = vld [vmem:[#allocation2 + $0x10] sm:$0xff]   ;;  %v1406_v4 = vunpack.c.l.bf16 %v1432_v1  ;;  %v1402_v5 = vunpack.c.l.bf16 %v1401_v2  ;;  %v1407_v6 = vunpack.c.h.bf16 %v1432_v1  ;;  %v1403_v7 = vunpack.c.h.bf16 %v1401_v2  ;;  %v1435_v8 = vld [vmem:[#allocation2 + $0x20] sm:$0xff]   ;;  %v646_v12 = vld [vmem:[#allocation8 + $0x1e8] sm:$0xff] }
  0x54   :  { %v1411_v9 = vunpack.c.h.bf16 %v1433_v3  ;;  %v1410_v10 = vunpack.c.l.bf16 %v1433_v3  ;;  %v1419_v11 = vunpack.c.h.bf16 %v1435_v8  ;;  %671 = vmatprep.subr.mxu0 %v646_v12  ;;  %v645_v17 = vld [vmem:[#allocation8 + $0x1e0] sm:$0xff]  ;;  %v642_v18 = vld [vmem:[#allocation8 + $0x1c8] sm:$0xff]  ;;  %v1418_v23 = vunpack.c.l.bf16 %v1435_v8  ;;  %v1434_v37 = vld [vmem:[#allocation2 + $0x18] sm:$0xff]  }
  0x55   :  { %v166_v13 = vcombine.high %v1406_v4, %v1406_v4  ;;  %v207_v14 = vsel %vm196_vm0, %v1406_v4, 0.0  ;;  %v164_v15 = vcombine.high %v1402_v5, %v1402_v5  ;;  %v197_v16 = vsel %vm196_vm0, %v1402_v5, 0.0  ;;  %v641_v19 = vld [vmem:[#allocation8 + $0x1c0] sm:$0xff]  ;;  %672 = vmatpush1.msra.mxu0 %v645_v17  ;;  %v638_v24 = vld [vmem:[#allocation8 + $0x1a8] sm:$0xff]  ;;  %v1437_v62 = vld [vmem:[#allocation2 + $0x30] sm:$0xff]  }
  0x56   :  { %v167_v20 = vcombine.high %v1407_v6, %v1407_v6  ;;  %v212_v21 = vsel %vm196_vm0, %v1407_v6, 0.0  ;;  %v165_v22 = vcombine.high %v1403_v7, %v1403_v7  ;;  %v202_v27 = vsel %vm196_vm0, %v1403_v7, 0.0  ;;  %673 = vmatprep.subr.mxu0 %v642_v18  ;;  %v1436_v33 = vld [vmem:[#allocation2 + $0x28] sm:$0xff]   ;;  %v637_v34 = vld [vmem:[#allocation8 + $0x1a0] sm:$0xff] }
  0x57   :  { %v208_v25 = vsel %vm196_vm0, %v166_v13, 0.0  ;;  %v198_v26 = vsel %vm196_vm0, %v164_v15, 0.0  ;;  %v169_v28 = vcombine.high %v1411_v9, %v1411_v9  ;;  %674 = vmatpush1.msra.mxu0 %v641_v19  ;;  %v222_v35 = vsel %vm196_vm0, %v1411_v9, 0.0  ;;  %v634_v38 = vld [vmem:[#allocation8 + $0x188] sm:$0xff]  ;;  %v633_v43 = vld [vmem:[#allocation8 + $0x180] sm:$0xff]  ;;  %v1438_v13 = vld [vmem:[#allocation2 + $0x38] sm:$0xff]  }
  0x58   :  { %v209_v29 = vadd.f32 %v208_v25, %v207_v14  ;;  %v199_v30 = vadd.f32 %v198_v26, %v197_v16  ;;  %v213_v31 = vsel %vm196_vm0, %v167_v20, 0.0  ;;  %v203_v32 = vsel %vm196_vm0, %v165_v22, 0.0  ;;  %675 = vmatprep.subr.mxu0 %v638_v24  ;;  %v630_v49 = vld [vmem:[#allocation8 + $0x168] sm:$0xff]  ;;  %v629_v52 = vld [vmem:[#allocation8 + $0x160] sm:$0xff] }
  0x59   :  { %v168_v36 = vcombine.high %v1410_v10, %v1410_v10  ;;  %v214_v39 = vadd.f32 %v213_v31, %v212_v21  ;;  %v204_v40 = vadd.f32 %v203_v32, %v202_v27  ;;  %v223_v41 = vsel %vm196_vm0, %v169_v28, 0.0  ;;  %676 = vmatpush1.msra.mxu0 %v637_v34  ;;  %v626_v57 = vld [vmem:[#allocation8 + $0x148] sm:$0xff]  ;;  %v625_v63 = vld [vmem:[#allocation8 + $0x140] sm:$0xff] }
  0x5a   :  { %210 = vadd.xlane.f32.xlu1 %v209_v29  ;;  %200 = vadd.xlane.f32.xlu0 %v199_v30  ;;  %v173_v42 = vcombine.high %v1419_v11, %v1419_v11  ;;  %v217_v44 = vsel %vm196_vm0, %v1410_v10, 0.0  ;;  %v172_v46 = vcombine.high %v1418_v23, %v1418_v23  ;;  %v1422_v47 = vunpack.c.l.bf16 %v1436_v33  ;;  %v622_v3 = vld [vmem:[#allocation8 + $0x128] sm:$0xff]  ;;  %v621_v8 = vld [vmem:[#allocation8 + $0x120] sm:$0xff] }
  0x5b   :  { %v218_v45 = vsel %vm196_vm0, %v168_v36, 0.0  ;;  %v1414_v48 = vunpack.c.l.bf16 %v1434_v37  ;;  %677 = vmatprep.subr.mxu0 %v634_v38  ;;  %v224_v50 = vadd.f32 %v223_v41, %v222_v35  ;;  %v242_v51 = vsel %vm196_vm0, %v1419_v11, 0.0  ;;  %v618_v14 = vld [vmem:[#allocation8 + $0x108] sm:$0xff]  ;;  %v617_v17 = vld [vmem:[#allocation8 + $0x100] sm:$0xff] }
  0x5c   :  { %678 = vmatpush1.msra.mxu0 %v633_v43  ;;  %v219_v53 = vadd.f32 %v218_v45, %v217_v44  ;;  %v243_v54 = vsel %vm196_vm0, %v173_v42, 0.0  ;;  %v174_v55 = vcombine.high %v1422_v47, %v1422_v47  ;;  %v1423_v56 = vunpack.c.h.bf16 %v1436_v33  ;;  %v614_v22 = vld [vmem:[#allocation8 + $0xe8] sm:$0xff]  ;;  %v613_v27 = vld [vmem:[#allocation8 + $0xe0] sm:$0xff] }
  0x5d   :  { %v237_v58 = vsel %vm196_vm0, %v1418_v23, 0.0  ;;  %v238_v59 = vsel %vm196_vm0, %v172_v46, 0.0  ;;  %v170_v60 = vcombine.high %v1414_v48, %v1414_v48  ;;  %v1415_v61 = vunpack.c.h.bf16 %v1434_v37  ;;  %679 = vmatprep.subr.mxu0 %v630_v49  ;;  %v610_v28 = vld [vmem:[#allocation8 + $0xc8] sm:$0xff]  ;;  %v609_v33 = vld [vmem:[#allocation8 + $0xc0] sm:$0xff] }
  0x5e   :  { %215 = vadd.xlane.f32.xlu1 %v214_v39  ;;  %205 = vadd.xlane.f32.xlu0 %v204_v40  ;;  %v244_v1 = vadd.f32 %v243_v54, %v242_v51  ;;  %v247_v2 = vsel %vm196_vm0, %v1422_v47, 0.0  ;;  %v239_v4 = vadd.f32 %v238_v59, %v237_v58  ;;  %v248_v5 = vsel %vm196_vm0, %v174_v55, 0.0  ;;  %v606_v38 = vld [vmem:[#allocation8 + $0xa8] sm:$0xff]  ;;  %v605_v39 = vld [vmem:[#allocation8 + $0xa0] sm:$0xff]  ;;  %v277_v55 = vld [vmem:[#allocation7] sm:$0xff] }
  0x5f   :  { %680 = vmatpush1.msra.mxu0 %v629_v52  ;;  %v175_v6 = vcombine.high %v1423_v56, %v1423_v56  ;;  %v1426_v7 = vunpack.c.l.bf16 %v1437_v62  ;;  %v227_v9 = vsel %vm196_vm0, %v1414_v48, 0.0  ;;  %v228_v10 = vsel %vm196_vm0, %v170_v60, 0.0  ;;  %v602_v42 = vld [vmem:[#allocation8 + $0x88] sm:$0xff]  ;;  %v601_v47 = vld [vmem:[#allocation8 + $0x80] sm:$0xff] }
  0x60   :  { %681 = vmatprep.subr.mxu0 %v626_v57  ;;  %v171_v11 = vcombine.high %v1415_v61, %v1415_v61  ;;  %v1427_v12 = vunpack.c.h.bf16 %v1437_v62  ;;  %v249_v15 = vadd.f32 %v248_v5, %v247_v2  ;;  %v252_v16 = vsel %vm196_vm0, %v1423_v56, 0.0  ;;  %v598_v48 = vld [vmem:[#allocation8 + $0x68] sm:$0xff]  ;;  %v597_v51 = vld [vmem:[#allocation8 + $0x60] sm:$0xff]  ;;  %v1945_v62 = vld [vmem:[#allocation7 + $0x8] sm:$0xff] }
  0x61   :  { %682 = vmatpush1.msra.mxu0 %v625_v63  ;;  %v229_v18 = vadd.f32 %v228_v10, %v227_v9  ;;  %v253_v19 = vsel %vm196_vm0, %v175_v6, 0.0  ;;  %v232_v20 = vsel %vm196_vm0, %v1415_v61, 0.0  ;;  %v176_v21 = vcombine.high %v1426_v7, %v1426_v7  ;;  %v594_v52 = vld [vmem:[#allocation8 + $0x48] sm:$0xff]  ;;  %v589_v56 = vld [vmem:[#allocation8 + $0x20] sm:$0xff]  ;;  %v848_v2 = vld [vmem:[#allocation10 + $0x78] sm:$0xff] }
  0x62   :  { %225 = vadd.xlane.f32.xlu1 %v224_v50  ;;  %220 = vadd.xlane.f32.xlu0 %v219_v53  ;;  %v233_v23 = vsel %vm196_vm0, %v171_v11, 0.0  ;;  %v177_v24 = vcombine.high %v1427_v12, %v1427_v12  ;;  %v1430_v25 = vunpack.c.l.bf16 %v1438_v13  ;;  %v1431_v26 = vunpack.c.h.bf16 %v1438_v13  ;;  %v593_v53 = vld [vmem:[#allocation8 + $0x40] sm:$0xff]  ;;  %v590_v54 = vld [vmem:[#allocation8 + $0x28] sm:$0xff]  ;;  %v860_v9 = vld [vmem:[#allocation10 + $0xd8] sm:$0xff] }
  0x63   :  { %683 = vmatprep.subr.mxu0 %v622_v3  ;;  %v254_v29 = vadd.f32 %v253_v19, %v252_v16  ;;  %v234_v30 = vadd.f32 %v233_v23, %v232_v20  ;;  %v257_v31 = vsel %vm196_vm0, %v1426_v7, 0.0  ;;  %v262_v32 = vsel %vm196_vm0, %v1427_v12, 0.0  ;;  %v586_v58 = vld [vmem:[#allocation8 + $0x8] sm:$0xff]  ;;  %v585_v59 = vld [vmem:[#allocation8] sm:$0xff]  ;;  %v863_v3 = vld [vmem:[#allocation10 + $0xf0] sm:$0xff] }
  0x64   :  { %684 = vmatpush1.msra.mxu0 %v621_v8  ;;  %v258_v34 = vsel %vm196_vm0, %v176_v21, 0.0  ;;  %v263_v35 = vsel %vm196_vm0, %v177_v24, 0.0  ;;  %v178_v36 = vcombine.high %v1430_v25, %v1430_v25  ;;  %v179_v37 = vcombine.high %v1431_v26, %v1431_v26  ;;  %v1938_v60 = vld [vmem:[#allocation5] sm:$0xff]  ;;  %v1943_v61 = vld [vmem:[#allocation5 + $0x8] sm:$0xff]  ;;  %v844_v10 = vld [vmem:[#allocation10 + $0x58] sm:$0xff] }
  0x65   :  { %685 = vmatprep.subr.mxu0 %v618_v14  ;;  %v259_v40 = vadd.f32 %v258_v34, %v257_v31  ;;  %v264_v41 = vadd.f32 %v263_v35, %v262_v32  ;;  %v267_v43 = vsel %vm196_vm0, %v1430_v25, 0.0  ;;  %v272_v45 = vsel %vm196_vm0, %v1431_v26, 0.0  ;;  %v862_v5 = vld [vmem:[#allocation10 + $0xe8] sm:$0xff]  ;;  %v861_v7 = vld [vmem:[#allocation10 + $0xe0] sm:$0xff]  ;;  %v859_v11 = vld [vmem:[#allocation10 + $0xd0] sm:$0xff] }
  0x66   :  { %245 = vadd.xlane.f32.xlu1 %v244_v1  ;;  %240 = vadd.xlane.f32.xlu0 %v239_v4  ;;  %v268_v44 = vsel %vm196_vm0, %v178_v36, 0.0  ;;  %v273_v46 = vsel %vm196_vm0, %v179_v37, 0.0  ;;  %v406_v57 = vcombine.high %v277_v55, %v277_v55  ;;  %v407_v63 = vcombine.high %v1945_v62, %v1945_v62  ;;  %v864_v1 = vld [vmem:[#allocation10 + $0xf8] sm:$0xff]  ;;  %v847_v4 = vld [vmem:[#allocation10 + $0x70] sm:$0xff]  ;;  %v846_v6 = vld [vmem:[#allocation10 + $0x68] sm:$0xff] }
  0x67   :  { %686 = vmatpush1.msra.mxu0 %v617_v17  ;;  %v269_v49 = vadd.f32 %v268_v44, %v267_v43  ;;  %v274_v50 = vadd.f32 %v273_v46, %v272_v45  ;;  %v845_v8 = vld [vmem:[#allocation10 + $0x60] sm:$0xff]  ;;  %v843_v12 = vld [vmem:[#allocation10 + $0x50] sm:$0xff]  ;;  %v858_v13 = vld [vmem:[#allocation10 + $0xc8] sm:$0xff]  ;;  %v281_v34 = vlaneseq  ;;  %vm383_vm1 = vcmask 1041409  }
  0x68   :  { %687 = vmatprep.subr.mxu0 %v614_v22  ;;  %1390 = vmatprep.subr.msk.mxu1 %vm196_vm0, %v406_v57  ;;  %v842_v14 = vld [vmem:[#allocation10 + $0x48] sm:$0xff]  ;;  %v841_v16 = vld [vmem:[#allocation10 + $0x40] sm:$0xff]  ;;  %v856_v17 = vld [vmem:[#allocation10 + $0xb8] sm:$0xff]  ;;  %vm385_vm2 = vcmask 1042434   ;;  %vm387_vm3 = vcmask 1043459   ;;  %vm389_vm4 = vcmask 1044484  }
  0x69   :  { %688 = vmatpush1.msra.mxu0 %v613_v27  ;;  %1391 = vmatpush1.msk.msra.mxu1 %vm196_vm0, %v277_v55  ;;  %v855_v19 = vld [vmem:[#allocation10 + $0xb0] sm:$0xff]  ;;  %v854_v21 = vld [vmem:[#allocation10 + $0xa8] sm:$0xff]  ;;  %v853_v23 = vld [vmem:[#allocation10 + $0xa0] sm:$0xff]  ;;  %v1951_v35 = vshrl.u32 %v281_v34, 7  ;;  %v318_v36 = vand.u32 127, %v281_v34  ;;  %vm391_vm5 = vcmask 1045509  }
  0x6a   :  { %250 = vadd.xlane.f32.xlu1 %v249_v15  ;;  %230 = vadd.xlane.f32.xlu0 %v229_v18  ;;  %v857_v15 = vld [vmem:[#allocation10 + $0xc0] sm:$0xff]  ;;  %v840_v18 = vld [vmem:[#allocation10 + $0x38] sm:$0xff]  ;;  %v839_v20 = vld [vmem:[#allocation10 + $0x30] sm:$0xff]  ;;  %vm393_vm6 = vcmask 1046534   ;;  %vm395_vm7 = vcmask 1047559   ;;  %vm408_vm8 = vcmask 31744  }
  0x6b   :  { %689 = vmatprep.subr.mxu0 %v610_v28  ;;  %1394 = vmatprep.subr.msk.mxu1 %vm196_vm0, %v407_v63  ;;  %v838_v22 = vld [vmem:[#allocation10 + $0x28] sm:$0xff]  ;;  %v837_v24 = vld [vmem:[#allocation10 + $0x20] sm:$0xff]  ;;  %v852_v25 = vld [vmem:[#allocation10 + $0x98] sm:$0xff] }
  0x6c   :  { %690 = vmatpush1.msra.mxu0 %v609_v33  ;;  %v836_v26 = vld [vmem:[#allocation10 + $0x18] sm:$0xff]  ;;  %v851_v27 = vld [vmem:[#allocation10 + $0x90] sm:$0xff]  ;;  %v849_v31 = vld [vmem:[#allocation10 + $0x80] sm:$0xff] }
  0x6d   :  { %691 = vmatprep.subr.mxu0 %v606_v38  ;;  %v835_v28 = vld [vmem:[#allocation10 + $0x10] sm:$0xff]  ;;  %v833_v32 = vld [vmem:[#allocation10] sm:$0xff]  ;;  %v1087_v33 = vld [vmem:[#allocation11 + $0xf8] sm:$0xff] }
  0x6e   :  { %255 = vadd.xlane.f32.xlu1 %v254_v29  ;;  %235 = vadd.xlane.f32.xlu0 %v234_v30  ;;  %v850_v29 = vld [vmem:[#allocation10 + $0x88] sm:$0xff]  ;;  %v627_v34 = vld [vmem:[#allocation8 + $0x150] sm:$0xff] }
  0x6f   :  { %692 = vmatpush1.msra.mxu0 %v605_v39  ;;  %v834_v30 = vld [vmem:[#allocation10 + $0x8] sm:$0xff]  ;;  %v321_v39 = vsub.s32 %v318_v36, %v1951_v35  ;;  %v624_v36 = vld [vmem:[#allocation8 + $0x138] sm:$0xff] }
  0x70   :  { %693 = vmatprep.subr.mxu0 %v602_v42 }
  0x71   :  { %694 = vmatpush1.msra.mxu0 %v601_v47 }
  0x72   :  { %260 = vadd.xlane.f32.xlu0 %v259_v40  ;;  %265 = vadd.xlane.f32.xlu1 %v264_v41 }
  0x73   :  { %695 = vmatprep.subr.mxu0 %v598_v48 }
  0x74   :  { %696 = vmatpush1.msra.mxu0 %v597_v51 }
  0x75   :  { %697 = vmatprep.subr.mxu0 %v594_v52 }
  0x76   :  { %270 = vadd.xlane.f32.xlu0 %v269_v49  ;;  %275 = vadd.xlane.f32.xlu1 %v274_v50 }
  0x77   :  { %698 = vmatpush1.msra.mxu0 %v593_v53 }
  0x78   :  { %699 = vmatprep.subr.mxu0 %v590_v54 }
  0x79   :  { %700 = vmatpush1.msra.mxu0 %v589_v56 }
  0x7a   :  { %701 = vmatprep.subr.mxu0 %v586_v58 }
  0x7b   :  { %702 = vmatpush1.msra.mxu0 %v585_v59 }
  0x7c   :  { %736 = vmatmul.mubr.f32.vlgmr.msra.gmra.mxu0 %v1938_v60  ;;  %1439 = vmatprep.subr.mxu0 %v864_v1 }
  0x7d   :  { %741 = vmatprep.mubr.f32.mxu0 %v1824_v0  ;;  %1440 = vmatpush3.msra.mxu0 %v848_v2 }
  0x7e   :  { %1441 = vmatprep.subr.mxu0 %v863_v3 }
  0x7f   :  { %1442 = vmatpush3.msra.mxu0 %v847_v4 }
  0x80   :  { %742 = vmatmul.mubr.f32.gmra.mxu0 %v1943_v61  ;;  %1443 = vmatprep.subr.mxu0 %v862_v5 }
  0x81   :  { %1444 = vmatpush3.msra.mxu0 %v846_v6 }
  0x82   :  { %1445 = vmatprep.subr.mxu0 %v861_v7 }
  0x83   :  { %1446 = vmatpush3.msra.mxu0 %v845_v8 }
  0x84   :  { %1447 = vmatprep.subr.mxu0 %v860_v9  ;;  %v648_v9 = vld [vmem:[#allocation8 + $0x1f8] sm:$0xff] }
  0x85   :  { %1448 = vmatpush3.msra.mxu0 %v844_v10 }
  0x86   :  { %1449 = vmatprep.subr.mxu0 %v859_v11 }
  0x87   :  { %1450 = vmatpush3.msra.mxu0 %v843_v12 }
  0x88   :  { %1451 = vmatprep.subr.mxu0 %v858_v13 }
  0x89   :  { %1452 = vmatpush3.msra.mxu0 %v842_v14 }
  0x8a   :  { %1453 = vmatprep.subr.mxu0 %v857_v15 }
  0x8b   :  { %1454 = vmatpush3.msra.mxu0 %v841_v16 }
  0x8c   :  { %1455 = vmatprep.subr.mxu0 %v856_v17 }
  0x8d   :  { %1456 = vmatpush3.msra.mxu0 %v840_v18 }
  0x8e   :  { %1457 = vmatprep.subr.mxu0 %v855_v19 }
  0x8f   :  { %1458 = vmatpush3.msra.mxu0 %v839_v20 }
  0x90   :  { %1459 = vmatprep.subr.mxu0 %v854_v21 }
  0x91   :  { %1460 = vmatpush3.msra.mxu0 %v838_v22 }
  0x92   :  { %1461 = vmatprep.subr.mxu0 %v853_v23 }
  0x93   :  { %1462 = vmatpush3.msra.mxu0 %v837_v24 }
  0x94   :  { %1463 = vmatprep.subr.mxu0 %v852_v25  ;;  %v644_v25 = vld [vmem:[#allocation8 + $0x1d8] sm:$0xff] }
  0x95   :  { %1464 = vmatpush3.msra.mxu0 %v836_v26  ;;  %v643_v26 = vld [vmem:[#allocation8 + $0x1d0] sm:$0xff] }
  0x96   :  { %1465 = vmatprep.subr.mxu0 %v851_v27  ;;  %v640_v27 = vld [vmem:[#allocation8 + $0x1b8] sm:$0xff] }
  0x97   :  { %1466 = vmatpush3.msra.mxu0 %v835_v28  ;;  %v639_v28 = vld [vmem:[#allocation8 + $0x1b0] sm:$0xff] }
  0x98   :  { %1467 = vmatprep.subr.mxu0 %v850_v29  ;;  %v636_v29 = vld [vmem:[#allocation8 + $0x198] sm:$0xff] }
  0x99   :  { %1468 = vmatpush3.msra.mxu0 %v834_v30  ;;  %v635_v30 = vld [vmem:[#allocation8 + $0x190] sm:$0xff] }
  0x9a   :  { %1469 = vmatprep.subr.mxu0 %v849_v31  ;;  %v632_v31 = vld [vmem:[#allocation8 + $0x178] sm:$0xff] }
  0x9b   :  { %1470 = vmatpush3.msra.mxu0 %v833_v32  ;;  %v631_v32 = vld [vmem:[#allocation8 + $0x170] sm:$0xff] }
  0x9c   :  { %1515 = vmatprep.subr.mxu0 %v1087_v33  ;;  %v628_v33 = vld [vmem:[#allocation8 + $0x158] sm:$0xff] }
  0xe3   :  { %v211_v37 = vpop.xlane.xlu1 %210  ;;  %v201_v38 = vpop.xlane.xlu0 %200 }
  0xe4   :  { %v322_v43 = vrot.slane %v201_v38, %v321_v39  ;;  %v330_v47 = vrot.slane %v211_v37, %v321_v39  ;;  %v623_v37 = vld [vmem:[#allocation8 + $0x130] sm:$0xff]  ;;  %v620_v38 = vld [vmem:[#allocation8 + $0x118] sm:$0xff] }
  0xe7   :  { %v216_v40 = vpop.xlane.xlu1 %215  ;;  %v206_v41 = vpop.xlane.xlu0 %205 }
  0xe8   :  { %v326_v42 = vrot.slane %v206_v41, %v321_v39  ;;  %v334_v48 = vrot.slane %v216_v40, %v321_v39  ;;  %v616_v40 = vld [vmem:[#allocation8 + $0xf8] sm:$0xff]  ;;  %v615_v41 = vld [vmem:[#allocation8 + $0xf0] sm:$0xff] }
  0xea   :  { %v384_v46 = vsel %vm383_vm1, %v326_v42, %v322_v43  ;;  %v612_v42 = vld [vmem:[#allocation8 + $0xd8] sm:$0xff]  ;;  %v611_v43 = vld [vmem:[#allocation8 + $0xd0] sm:$0xff] }
  0xeb   :  { %v226_v44 = vpop.xlane.xlu1 %225  ;;  %v221_v45 = vpop.xlane.xlu0 %220  ;;  %v386_v49 = vsel %vm385_vm2, %v330_v47, %v384_v46  ;;  %v604_v46 = vld [vmem:[#allocation8 + $0x98] sm:$0xff]  ;;  %v603_v47 = vld [vmem:[#allocation8 + $0x90] sm:$0xff] }
  0xec   :  { %v338_v52 = vrot.slane %v221_v45, %v321_v39  ;;  %v388_v53 = vsel %vm387_vm3, %v334_v48, %v386_v49  ;;  %v342_v56 = vrot.slane %v226_v44, %v321_v39  ;;  %v608_v44 = vld [vmem:[#allocation8 + $0xb8] sm:$0xff]  ;;  %v607_v45 = vld [vmem:[#allocation8 + $0xb0] sm:$0xff] }
  0xed   :  { %v600_v48 = vld [vmem:[#allocation8 + $0x78] sm:$0xff]  ;;  %v599_v49 = vld [vmem:[#allocation8 + $0x70] sm:$0xff] }
  0xee   :  { %v390_v57 = vsel %vm389_vm4, %v338_v52, %v388_v53  ;;  %v592_v52 = vld [vmem:[#allocation8 + $0x38] sm:$0xff]  ;;  %v591_v53 = vld [vmem:[#allocation8 + $0x30] sm:$0xff] }
  0xef   :  { %v246_v50 = vpop.xlane.xlu1 %245  ;;  %v241_v51 = vpop.xlane.xlu0 %240  ;;  %v392_v4 = vsel %vm391_vm5, %v342_v56, %v390_v57  ;;  %v283_v56 = vsub.s32 0, %v1951_v35  ;;  %v1985_v57 = vld [vmem:[%s2045_s5] sm:$0xf] }
  0xf0   :  { %v358_v59 = vrot.slane %v246_v50, %v321_v39  ;;  %v354_v63 = vrot.slane %v241_v51, %v321_v39  ;;  %v596_v50 = vld [vmem:[#allocation8 + $0x58] sm:$0xff]  ;;  %v595_v51 = vld [vmem:[#allocation8 + $0x50] sm:$0xff] }
  0xf2   :  { %v397_v10 = vsel %vm383_vm1, %v358_v59, %v354_v63  ;;  %v654_v59 = vrot.slane %v1985_v57, %v283_v56 }
  0xf3   :  { %v251_v54 = vpop.xlane.xlu1 %250  ;;  %v231_v55 = vpop.xlane.xlu0 %230 }
  0xf4   :  { %v346_v58 = vrot.slane %v231_v55, %v321_v39  ;;  %v362_v3 = vrot.slane %v251_v54, %v321_v39  ;;  %v588_v54 = vld [vmem:[#allocation8 + $0x18] sm:$0xff]  ;;  %v587_v55 = vld [vmem:[#allocation8 + $0x10] sm:$0xff] }
  0xf6   :  { %v394_v6 = vsel %vm393_vm6, %v346_v58, %v392_v4  ;;  %v398_v13 = vsel %vm385_vm2, %v362_v3, %v397_v10  ;;  %v287_v58 = vsub.s32 1, %v1951_v35  ;;  %v1070_v10 = vld [vmem:[#allocation11 + $0x70] sm:$0xff] }
  0xf7   :  { %v256_v1 = vpop.xlane.xlu1 %255  ;;  %v236_v2 = vpop.xlane.xlu0 %235 }
  0xf8   :  { %v350_v5 = vrot.slane %v236_v2, %v321_v39  ;;  %v366_v7 = vrot.slane %v256_v1, %v321_v39 }
  0xfa   :  { %v396_v8 = vsel %vm395_vm7, %v350_v5, %v394_v6  ;;  %v399_v15 = vsel %vm387_vm3, %v366_v7, %v398_v13  ;;  %v1071_v6 = vld [vmem:[#allocation11 + $0x78] sm:$0xff] }
  0xfb   :  { %1392 = vmatmul.mubr.msk.f32.vlgmr.msra.gmra.mxu1 %vm408_vm8, %v396_v8  ;;  %v261_v11 = vpop.xlane.xlu0 %260  ;;  %v266_v12 = vpop.xlane.xlu1 %265 }
  0xfc   :  { %v370_v14 = vrot.slane %v261_v11, %v321_v39  ;;  %1395 = vmatpush1.msk.msra.mxu1 %vm196_vm0, %v1945_v62  ;;  %491 = vmatprep.mubr.f32.mxu1 %v1824_v0  ;;  %v374_v16 = vrot.slane %v266_v12, %v321_v39  ;;  %v647_v62 = vld [vmem:[#allocation8 + $0x1f0] sm:$0xff]  ;;  %v1085_v12 = vld [vmem:[#allocation11 + $0xe8] sm:$0xff] }
  0xfd   :  { %748 = vmatprep.subr.mxu1 %v648_v9 }
  0xfe   :  { %v400_v17 = vsel %vm389_vm4, %v370_v14, %v399_v15  ;;  %v1069_v14 = vld [vmem:[#allocation11 + $0x68] sm:$0xff]  ;;  %v1084_v15 = vld [vmem:[#allocation11 + $0xe0] sm:$0xff] }
  0xff   :  { %v271_v18 = vpop.xlane.xlu0 %270  ;;  %v276_v19 = vpop.xlane.xlu1 %275  ;;  %v401_v22 = vsel %vm391_vm5, %v374_v16, %v400_v17  ;;  %v1068_v16 = vld [vmem:[#allocation11 + $0x60] sm:$0xff]  ;;  %v1083_v17 = vld [vmem:[#allocation11 + $0xd8] sm:$0xff] }
 0x100   :  { %v378_v20 = vrot.slane %v271_v18, %v321_v39  ;;  %v382_v21 = vrot.slane %v276_v19, %v321_v39  ;;  %v619_v39 = vld [vmem:[#allocation8 + $0x110] sm:$0xff]  ;;  %v1067_v18 = vld [vmem:[#allocation11 + $0x58] sm:$0xff] }
 0x101   :  { %v1082_v19 = vld [vmem:[#allocation11 + $0xd0] sm:$0xff] }
 0x102   :  { %v402_v23 = vsel %vm393_vm6, %v378_v20, %v401_v22  ;;  %v1066_v20 = vld [vmem:[#allocation11 + $0x50] sm:$0xff]  ;;  %v896_v22 = vld [vmem:[#allocation10 + $0x1f8] sm:$0xff] }
 0x103   :  { %v403_v24 = vsel %vm395_vm7, %v382_v21, %v402_v23  ;;  %v1081_v21 = vld [vmem:[#allocation11 + $0xc8] sm:$0xff] }
 0x104   :  { %1393 = vmatmul.mubr.msk.f32.gmra.mxu1 %vm408_vm8, %v403_v24  ;;  %v1065_v23 = vld [vmem:[#allocation11 + $0x48] sm:$0xff] }
 0x105   :  { %562 = vmatprep.mubr.f32.mxu1 %v1824_v0 }
 0x108   :  { %1396 = vmatmul.mubr.msk.f32.vlgmr.msra.gmra.mxu1 %vm408_vm8, %v396_v8  ;;  %v1086_v8 = vld [vmem:[#allocation11 + $0xf0] sm:$0xff] }
 0x109   :  { %749 = vmatpush1.msra.mxu1 %v647_v62  ;;  %568 = vmatprep.mubr.f32.mxu1 %v1824_v0  ;;  %v1080_v62 = vld [vmem:[#allocation11 + $0xc0] sm:$0xff] }
 0x10a   :  { %750 = vmatprep.subr.mxu1 %v644_v25  ;;  %v1064_v25 = vld [vmem:[#allocation11 + $0x40] sm:$0xff] }
 0x10b   :  { %751 = vmatpush1.msra.mxu1 %v643_v26  ;;  %v895_v26 = vld [vmem:[#allocation10 + $0x1f0] sm:$0xff] }
 0x10c   :  { %752 = vmatprep.subr.mxu1 %v640_v27  ;;  %1397 = vmatmul.mubr.msk.f32.gmra.mxu1 %vm408_vm8, %v403_v24  ;;  %v880_v24 = vld [vmem:[#allocation10 + $0x178] sm:$0xff]  ;;  %v879_v27 = vld [vmem:[#allocation10 + $0x170] sm:$0xff] }
 0x10d   :  { %753 = vmatpush1.msra.mxu1 %v639_v28  ;;  %812 = vmatprep.mubr.f32.mxu1 %v1824_v0  ;;  %v894_v28 = vld [vmem:[#allocation10 + $0x1e8] sm:$0xff] }
 0x10e   :  { %754 = vmatprep.subr.mxu1 %v636_v29  ;;  %v878_v29 = vld [vmem:[#allocation10 + $0x168] sm:$0xff] }
 0x10f   :  { %755 = vmatpush1.msra.mxu1 %v635_v30  ;;  %v1079_v30 = vld [vmem:[#allocation11 + $0xb8] sm:$0xff] }
 0x110   :  { %756 = vmatprep.subr.mxu1 %v632_v31  ;;  %v893_v31 = vld [vmem:[#allocation10 + $0x1e0] sm:$0xff] }
 0x111   :  { %757 = vmatpush1.msra.mxu1 %v631_v32  ;;  %v1063_v32 = vld [vmem:[#allocation11 + $0x38] sm:$0xff] }
 0x112   :  { %758 = vmatprep.subr.mxu1 %v628_v33  ;;  %v877_v33 = vld [vmem:[#allocation10 + $0x160] sm:$0xff] }
 0x113   :  { %759 = vmatpush1.msra.mxu1 %v627_v34  ;;  %v1078_v34 = vld [vmem:[#allocation11 + $0xb0] sm:$0xff] }
 0x114   :  { %760 = vmatprep.subr.mxu1 %v624_v36  ;;  %v892_v36 = vld [vmem:[#allocation10 + $0x1d8] sm:$0xff] }
 0x115   :  { %761 = vmatpush1.msra.mxu1 %v623_v37  ;;  %v1062_v37 = vld [vmem:[#allocation11 + $0x30] sm:$0xff] }
 0x116   :  { %762 = vmatprep.subr.mxu1 %v620_v38  ;;  %v876_v38 = vld [vmem:[#allocation10 + $0x158] sm:$0xff] }
 0x117   :  { %763 = vmatpush1.msra.mxu1 %v619_v39  ;;  %v1077_v39 = vld [vmem:[#allocation11 + $0xa8] sm:$0xff] }
 0x118   :  { %764 = vmatprep.subr.mxu1 %v616_v40  ;;  %v891_v40 = vld [vmem:[#allocation10 + $0x1d0] sm:$0xff] }
 0x119   :  { %765 = vmatpush1.msra.mxu1 %v615_v41  ;;  %v1061_v41 = vld [vmem:[#allocation11 + $0x28] sm:$0xff] }
 0x11a   :  { %766 = vmatprep.subr.mxu1 %v612_v42  ;;  %v875_v42 = vld [vmem:[#allocation10 + $0x150] sm:$0xff] }
 0x11b   :  { %767 = vmatpush1.msra.mxu1 %v611_v43  ;;  %v1076_v43 = vld [vmem:[#allocation11 + $0xa0] sm:$0xff] }
 0x11c   :  { %768 = vmatprep.subr.mxu1 %v608_v44  ;;  %v890_v44 = vld [vmem:[#allocation10 + $0x1c8] sm:$0xff] }
 0x11d   :  { %769 = vmatpush1.msra.mxu1 %v607_v45  ;;  %v1060_v45 = vld [vmem:[#allocation11 + $0x20] sm:$0xff] }
 0x11e   :  { %770 = vmatprep.subr.mxu1 %v604_v46  ;;  %v874_v46 = vld [vmem:[#allocation10 + $0x148] sm:$0xff] }
 0x11f   :  { %771 = vmatpush1.msra.mxu1 %v603_v47  ;;  %v1075_v47 = vld [vmem:[#allocation11 + $0x98] sm:$0xff] }
 0x120   :  { %772 = vmatprep.subr.mxu1 %v600_v48  ;;  %v889_v48 = vld [vmem:[#allocation10 + $0x1c0] sm:$0xff] }
 0x121   :  { %773 = vmatpush1.msra.mxu1 %v599_v49  ;;  %v1059_v49 = vld [vmem:[#allocation11 + $0x18] sm:$0xff] }
 0x122   :  { %774 = vmatprep.subr.mxu1 %v596_v50  ;;  %v873_v50 = vld [vmem:[#allocation10 + $0x140] sm:$0xff] }
 0x123   :  { %775 = vmatpush1.msra.mxu1 %v595_v51  ;;  %v1074_v51 = vld [vmem:[#allocation11 + $0x90] sm:$0xff] }
 0x124   :  { %776 = vmatprep.subr.mxu1 %v592_v52  ;;  %v888_v52 = vld [vmem:[#allocation10 + $0x1b8] sm:$0xff] }
 0x125   :  { %777 = vmatpush1.msra.mxu1 %v591_v53  ;;  %v1058_v53 = vld [vmem:[#allocation11 + $0x10] sm:$0xff] }
 0x126   :  { %778 = vmatprep.subr.mxu1 %v588_v54  ;;  %v872_v54 = vld [vmem:[#allocation10 + $0x138] sm:$0xff] }
 0x127   :  { %779 = vmatpush1.msra.mxu1 %v587_v55  ;;  %v1073_v55 = vld [vmem:[#allocation11 + $0x88] sm:$0xff] }
 0x128   :  { %813 = vmatmul.mubr.f32.vlgmr.msra.gmra.mxu1 %v1938_v60  ;;  %v658_v60 = vrot.slane %v1985_v57, %v287_v58  ;;  %1477 = vmatprep.subr.mxu1 %v896_v22 }
 0x129   :  { %818 = vmatprep.mubr.f32.mxu1 %v1824_v0  ;;  %1478 = vmatpush3.msra.mxu1 %v880_v24 }
 0x12a   :  { %1479 = vmatprep.subr.mxu1 %v895_v26 }
 0x12b   :  { %1480 = vmatpush3.msra.mxu1 %v879_v27 }
 0x12c   :  { %819 = vmatmul.mubr.f32.gmra.mxu1 %v1943_v61  ;;  %1481 = vmatprep.subr.mxu1 %v894_v28 }
 0x12d   :  { %1482 = vmatpush3.msra.mxu1 %v878_v29  ;;  %v291_v29 = vsub.s32 2, %v1951_v35 }
 0x12e   :  { %1483 = vmatprep.subr.mxu1 %v893_v31 }
 0x12f   :  { %1484 = vmatpush3.msra.mxu1 %v877_v33 }
 0x130   :  { %1485 = vmatprep.subr.mxu1 %v892_v36 }
 0x131   :  { %1486 = vmatpush3.msra.mxu1 %v876_v38 }
 0x132   :  { %1487 = vmatprep.subr.mxu1 %v891_v40 }
 0x133   :  { %1488 = vmatpush3.msra.mxu1 %v875_v42 }
 0x134   :  { %1489 = vmatprep.subr.mxu1 %v890_v44 }
 0x135   :  { %1490 = vmatpush3.msra.mxu1 %v874_v46 }
 0x136   :  { %1491 = vmatprep.subr.mxu1 %v889_v48  ;;  %v1118_v48 = vld [vmem:[#allocation11 + $0x1f0] sm:$0xff] }
 0x137   :  { %1492 = vmatpush3.msra.mxu1 %v873_v50  ;;  %v1117_v50 = vld [vmem:[#allocation11 + $0x1e8] sm:$0xff] }
 0x138   :  { %1493 = vmatprep.subr.mxu1 %v888_v52  ;;  %v1101_v52 = vld [vmem:[#allocation11 + $0x168] sm:$0xff] }
 0x139   :  { %1494 = vmatpush3.msra.mxu1 %v872_v54  ;;  %v1116_v54 = vld [vmem:[#allocation11 + $0x1e0] sm:$0xff] }
 0x13c   :  { %v737_v0 = vpop.f32.mrf.mxu0 }
 0x13d   :  { %v738_v63 = vadd.f32 %v737_v0, %v654_v59  ;;  %v871_v0 = vld [vmem:[#allocation10 + $0x130] sm:$0xff] }
 0x13e   :  { %v739_v61 = vpop.f32.mrf.mxu0 }
 0x13f   :  { %v740_v1 = vadd.f32 %v739_v61, %v658_v60  ;;  %v825_v2 = vmax.f32 %v738_v63, 0.0  ;;  %v1072_v63 = vld [vmem:[#allocation11 + $0x80] sm:$0xff]  ;;  %v886_v61 = vld [vmem:[#allocation10 + $0x1a8] sm:$0xff] }
 0x140   :  { %v743_v3 = vpop.f32.mrf.mxu0 }
 0x141   :  { %v826_v4 = vmax.f32 %v740_v1, 0.0  ;;  %v744_v5 = vadd.f32 %v743_v3, %v654_v59  ;;  %v887_v59 = vld [vmem:[#allocation10 + $0x1b0] sm:$0xff]  ;;  %v1056_v1 = vld [vmem:[#allocation11] sm:$0xff] }
 0x142   :  { %v745_v7 = vpop.f32.mrf.mxu0  ;;  %1495 = vmatprep.subr.mxu1 %v887_v59  ;;  %v885_v3 = vld [vmem:[#allocation10 + $0x1a0] sm:$0xff]  ;;  %v1115_v59 = vld [vmem:[#allocation11 + $0x1d8] sm:$0xff] }
 0x143   :  { %968 = vmatprep.mubr.f32.mxu0 %v826_v4  ;;  %v746_v9 = vadd.f32 %v745_v7, %v658_v60  ;;  %v829_v11 = vmax.f32 %v744_v5, 0.0  ;;  %v1057_v60 = vld [vmem:[#allocation11 + $0x8] sm:$0xff]  ;;  %1496 = vmatpush3.msra.mxu1 %v871_v0  ;;  %v869_v4 = vld [vmem:[#allocation10 + $0x120] sm:$0xff]  ;;  %v884_v5 = vld [vmem:[#allocation10 + $0x198] sm:$0xff] }
 0x144   :  { %969 = vmatmul.mubr.f32.vlgmr.msra.gmra.mxu0 %v825_v2  ;;  %v870_v2 = vld [vmem:[#allocation10 + $0x128] sm:$0xff]  ;;  %1497 = vmatprep.subr.mxu1 %v886_v61  ;;  %v883_v7 = vld [vmem:[#allocation10 + $0x190] sm:$0xff] }
 0x145   :  { %1516 = vmatpush3.msra.mxu0 %v1071_v6  ;;  %v830_v13 = vmax.f32 %v746_v9, 0.0  ;;  %1498 = vmatpush3.msra.mxu1 %v870_v2  ;;  %v868_v6 = vld [vmem:[#allocation10 + $0x118] sm:$0xff]  ;;  %v882_v9 = vld [vmem:[#allocation10 + $0x188] sm:$0xff]  ;;  %v1114_v0 = vld [vmem:[#allocation11 + $0x1d0] sm:$0xff] }
 0x146   :  { %1517 = vmatprep.subr.mxu0 %v1086_v8  ;;  %1499 = vmatprep.subr.mxu1 %v885_v3  ;;  %v867_v8 = vld [vmem:[#allocation10 + $0x110] sm:$0xff]  ;;  %v1113_v61 = vld [vmem:[#allocation11 + $0x1c8] sm:$0xff]  ;;  %v1112_v2 = vld [vmem:[#allocation11 + $0x1c0] sm:$0xff] }
 0x147   :  { %1518 = vmatpush3.msra.mxu0 %v1070_v10  ;;  %973 = vmatprep.mubr.f32.mxu0 %v830_v13  ;;  %v866_v10 = vld [vmem:[#allocation10 + $0x108] sm:$0xff]  ;;  %v1119_v13 = vld [vmem:[#allocation11 + $0x1f8] sm:$0xff]  ;;  %v1096_v3 = vld [vmem:[#allocation11 + $0x140] sm:$0xff] }
 0x148   :  { %1519 = vmatprep.subr.mxu0 %v1085_v12  ;;  %974 = vmatmul.mubr.f32.gmra.mxu0 %v829_v11  ;;  %v881_v11 = vld [vmem:[#allocation10 + $0x180] sm:$0xff] }
 0x149   :  { %1520 = vmatpush3.msra.mxu0 %v1069_v14  ;;  %1500 = vmatpush3.msra.mxu1 %v869_v4  ;;  %v865_v12 = vld [vmem:[#allocation10 + $0x100] sm:$0xff]  ;;  %v1111_v4 = vld [vmem:[#allocation11 + $0x1b8] sm:$0xff] }
 0x14a   :  { %1521 = vmatprep.subr.mxu0 %v1084_v15  ;;  %1501 = vmatprep.subr.mxu1 %v884_v5  ;;  %v1997_v14 = vld [vmem:[%s2043_s3] sm:$0xf]  ;;  %v1095_v5 = vld [vmem:[#allocation11 + $0x138] sm:$0xff] }
 0x14b   :  { %1522 = vmatpush3.msra.mxu0 %v1068_v16  ;;  %1502 = vmatpush3.msra.mxu1 %v868_v6  ;;  %v284_v15 = vrot.slane %v1997_v14, %v283_v56  ;;  %v288_v16 = vrot.slane %v1997_v14, %v287_v58  ;;  %v1110_v6 = vld [vmem:[#allocation11 + $0x1b0] sm:$0xff] }
 0x14c   :  { %1523 = vmatprep.subr.mxu0 %v1083_v17  ;;  %1503 = vmatprep.subr.mxu1 %v883_v7  ;;  %v1094_v7 = vld [vmem:[#allocation11 + $0x130] sm:$0xff] }
 0x14d   :  { %1524 = vmatpush3.msra.mxu0 %v1067_v18  ;;  %1504 = vmatpush3.msra.mxu1 %v867_v8  ;;  %v1109_v8 = vld [vmem:[#allocation11 + $0x1a8] sm:$0xff] }
 0x14e   :  { %1525 = vmatprep.subr.mxu0 %v1082_v19  ;;  %1505 = vmatprep.subr.mxu1 %v882_v9  ;;  %v1093_v9 = vld [vmem:[#allocation11 + $0x128] sm:$0xff] }
 0x14f   :  { %1526 = vmatpush3.msra.mxu0 %v1066_v20  ;;  %1506 = vmatpush3.msra.mxu1 %v866_v10  ;;  %v1108_v10 = vld [vmem:[#allocation11 + $0x1a0] sm:$0xff] }
 0x150   :  { %1527 = vmatprep.subr.mxu0 %v1081_v21  ;;  %1507 = vmatprep.subr.mxu1 %v881_v11  ;;  %v1092_v11 = vld [vmem:[#allocation11 + $0x120] sm:$0xff] }
 0x151   :  { %1528 = vmatpush3.msra.mxu0 %v1065_v23  ;;  %1508 = vmatpush3.msra.mxu1 %v865_v12  ;;  %v1107_v12 = vld [vmem:[#allocation11 + $0x198] sm:$0xff] }
 0x152   :  { %1529 = vmatprep.subr.mxu0 %v1080_v62  ;;  %1553 = vmatprep.subr.mxu1 %v1119_v13  ;;  %v292_v13 = vrot.slane %v1997_v14, %v291_v29 }
 0x153   :  { %1530 = vmatpush3.msra.mxu0 %v1064_v25 }
 0x154   :  { %1531 = vmatprep.subr.mxu0 %v1079_v30  ;;  %v295_v30 = vsub.s32 3, %v1951_v35  ;;  %v1088_v35 = vld [vmem:[#allocation11 + $0x100] sm:$0xff] }
 0x155   :  { %1532 = vmatpush3.msra.mxu0 %v1063_v32  ;;  %v662_v32 = vrot.slane %v1985_v57, %v291_v29  ;;  %v1129_v29 = vld [vmem:[#allocation11 + $0x248] sm:$0xff] }
 0x156   :  { %1533 = vmatprep.subr.mxu0 %v1078_v34  ;;  %v666_v33 = vrot.slane %v1985_v57, %v295_v30  ;;  %v2018_v38 = vrot.slane %v1997_v14, %v295_v30  ;;  %v1102_v57 = vld [vmem:[#allocation11 + $0x170] sm:$0xff]  ;;  %v1128_v30 = vld [vmem:[#allocation11 + $0x240] sm:$0xff] }
 0x157   :  { %1534 = vmatpush3.msra.mxu0 %v1062_v37 }
 0x158   :  { %1535 = vmatprep.subr.mxu0 %v1077_v39 }
 0x159   :  { %1536 = vmatpush3.msra.mxu0 %v1061_v41 }
 0x15a   :  { %1537 = vmatprep.subr.mxu0 %v1076_v43 }
 0x15b   :  { %1538 = vmatpush3.msra.mxu0 %v1060_v45  ;;  %v1103_v45 = vld [vmem:[#allocation11 + $0x178] sm:$0xff] }
 0x15c   :  { %1539 = vmatprep.subr.mxu0 %v1075_v47 }
 0x15d   :  { %1540 = vmatpush3.msra.mxu0 %v1059_v49 }
 0x15e   :  { %1541 = vmatprep.subr.mxu0 %v1074_v51 }
 0x15f   :  { %1542 = vmatpush3.msra.mxu0 %v1058_v53 }
 0x160   :  { %1543 = vmatprep.subr.mxu0 %v1073_v55  ;;  %v1100_v55 = vld [vmem:[#allocation11 + $0x160] sm:$0xff] }
 0x161   :  { %1544 = vmatpush3.msra.mxu0 %v1057_v60  ;;  %v1099_v60 = vld [vmem:[#allocation11 + $0x158] sm:$0xff] }
 0x162   :  { %1545 = vmatprep.subr.mxu0 %v1072_v63  ;;  %v1098_v63 = vld [vmem:[#allocation11 + $0x150] sm:$0xff] }
 0x163   :  { %1546 = vmatpush3.msra.mxu0 %v1056_v1  ;;  %v1097_v1 = vld [vmem:[#allocation11 + $0x148] sm:$0xff] }
 0x1bb   :  { %v487_v17 = vpop.f32.mrf.mxu1 }
 0x1bc   :  { %v488_v18 = vadd.f32 %v487_v17, %v284_v15  ;;  %v1090_v17 = vld [vmem:[#allocation11 + $0x110] sm:$0xff] }
 0x1bd   :  { %v489_v19 = vpop.f32.mrf.mxu1 }
 0x1be   :  { %v490_v20 = vadd.f32 %v489_v19, %v288_v16  ;;  %v575_v22 = vmax.f32 %v488_v18, 0.0  ;;  %v1105_v18 = vld [vmem:[#allocation11 + $0x188] sm:$0xff] }
 0x1c0   :  { %v576_v21 = vmax.f32 %v490_v20, 0.0  ;;  %v1089_v20 = vld [vmem:[#allocation11 + $0x108] sm:$0xff] }
 0x1c2   :  { %1207 = vmatprep.mubr.f32.mxu0 %v576_v21 }
 0x1c3   :  { %1208 = vmatmul.mubr.f32.vlgmr.msra.gmra.mxu0 %v575_v22  ;;  %v1104_v22 = vld [vmem:[#allocation11 + $0x180] sm:$0xff] }
 0x1c4   :  { %v493_v23 = vpop.f32.mrf.mxu1 }
 0x1c5   :  { %v494_v24 = vadd.f32 %v493_v23, %v284_v15  ;;  %v1091_v15 = vld [vmem:[#allocation11 + $0x118] sm:$0xff] }
 0x1c6   :  { %v495_v62 = vpop.f32.mrf.mxu1 }
 0x1c7   :  { %v496_v25 = vadd.f32 %v495_v62, %v288_v16  ;;  %v579_v27 = vmax.f32 %v494_v24, 0.0  ;;  %v1106_v16 = vld [vmem:[#allocation11 + $0x190] sm:$0xff]  ;;  %v1135_v62 = vld [vmem:[#allocation11 + $0x278] sm:$0xff] }
 0x1c8   :  { %v2005_v56 = vpop.f32.mrf.mxu1  ;;  %1609 = vmatprep.subr.mxu0 %v1135_v62 }
 0x1c9   :  { %v580_v26 = vmax.f32 %v496_v25, 0.0  ;;  %v565_v19 = vadd.f32 %v2005_v56, %v292_v13  ;;  %v1134_v25 = vld [vmem:[#allocation11 + $0x270] sm:$0xff]  ;;  %1610 = vmatpush3.msra.mxu0 %v1135_v62  ;;  %v1132_v56 = vld [vmem:[#allocation11 + $0x260] sm:$0xff] }
 0x1ca   :  { %v566_v28 = vpop.f32.mrf.mxu1  ;;  %1611 = vmatprep.subr.mxu0 %v1134_v25 }
 0x1cb   :  { %1212 = vmatprep.mubr.f32.mxu0 %v580_v26  ;;  %v567_v46 = vadd.f32 %v566_v28, %v2018_v38  ;;  %v577_v14 = vmax.f32 %v565_v19, 0.0  ;;  %1612 = vmatpush3.msra.mxu0 %v1134_v25  ;;  %v1131_v28 = vld [vmem:[#allocation11 + $0x258] sm:$0xff] }
 0x1cc   :  { %1213 = vmatmul.mubr.f32.gmra.mxu0 %v579_v27  ;;  %v2007_v58 = vpop.f32.mrf.mxu1  ;;  %v1133_v27 = vld [vmem:[#allocation11 + $0x268] sm:$0xff] }
 0x1cd   :  { %v578_v53 = vmax.f32 %v567_v46, 0.0  ;;  %v571_v23 = vadd.f32 %v2007_v58, %v292_v13  ;;  %1613 = vmatprep.subr.mxu0 %v1133_v27  ;;  %v1130_v58 = vld [vmem:[#allocation11 + $0x250] sm:$0xff] }
 0x1ce   :  { %v2011_v31 = vpop.f32.mrf.mxu1  ;;  %1614 = vmatpush3.msra.mxu0 %v1133_v27 }
 0x1cf   :  { %v573_v21 = vadd.f32 %v2011_v31, %v2018_v38  ;;  %v581_v26 = vmax.f32 %v571_v23, 0.0  ;;  %1615 = vmatprep.subr.mxu0 %v1132_v56  ;;  %v1127_v31 = vld [vmem:[#allocation11 + $0x238] sm:$0xff]  ;;  %v1121_v38 = vld [vmem:[#allocation11 + $0x208] sm:$0xff] }
 0x1d0   :  { %1616 = vmatpush3.msra.mxu0 %v1132_v56 }
 0x1d1   :  { %v582_v24 = vmax.f32 %v573_v21, 0.0  ;;  %1617 = vmatprep.subr.mxu0 %v1131_v28 }
 0x1d2   :  { %1618 = vmatpush3.msra.mxu0 %v1131_v28 }
 0x1d3   :  { %1619 = vmatprep.subr.mxu0 %v1130_v58 }
 0x1d4   :  { %1620 = vmatpush3.msra.mxu0 %v1130_v58 }
 0x1d5   :  { %1621 = vmatprep.subr.mxu0 %v1129_v29 }
 0x1d6   :  { %1622 = vmatpush3.msra.mxu0 %v1129_v29 }
 0x1d7   :  { %1623 = vmatprep.subr.mxu0 %v1128_v30 }
 0x1d8   :  { %1624 = vmatpush3.msra.mxu0 %v1128_v30 }
 0x1d9   :  { %1625 = vmatprep.subr.mxu0 %v1127_v31 }
 0x1da   :  { %1626 = vmatpush3.msra.mxu0 %v1127_v31 }
 0x1e8   :  { %v814_v34 = vpop.f32.mrf.mxu1 }
 0x1e9   :  { %v815_v36 = vadd.f32 %v814_v34, %v662_v32  ;;  %v1124_v34 = vld [vmem:[#allocation11 + $0x220] sm:$0xff] }
 0x1ea   :  { %v816_v37 = vpop.f32.mrf.mxu1 }
 0x1eb   :  { %v817_v39 = vadd.f32 %v816_v37, %v666_v33  ;;  %v827_v42 = vmax.f32 %v815_v36, 0.0  ;;  %v1123_v36 = vld [vmem:[#allocation11 + $0x218] sm:$0xff]  ;;  %v1122_v37 = vld [vmem:[#allocation11 + $0x210] sm:$0xff] }
 0x1ec   :  { %v820_v40 = vpop.f32.mrf.mxu1 }
 0x1ed   :  { %v828_v41 = vmax.f32 %v817_v39, 0.0  ;;  %v821_v43 = vadd.f32 %v820_v40, %v662_v32  ;;  %v1126_v32 = vld [vmem:[#allocation11 + $0x230] sm:$0xff]  ;;  %v1120_v39 = vld [vmem:[#allocation11 + $0x200] sm:$0xff] }
 0x1ee   :  { %v822_v44 = vpop.f32.mrf.mxu1  ;;  %1627 = vmatprep.subr.mxu0 %v1126_v32 }
 0x1ef   :  { %v823_v47 = vadd.f32 %v822_v44, %v666_v33  ;;  %1043 = vmatprep.mubr.f32.mxu1 %v828_v41  ;;  %v831_v51 = vmax.f32 %v821_v43, 0.0  ;;  %1628 = vmatpush3.msra.mxu0 %v1126_v32  ;;  %v1125_v33 = vld [vmem:[#allocation11 + $0x228] sm:$0xff]  ;;  %v1398_v44 = vld [vmem:[%s2047_s7] ss:$0 sm:$0xff] }
 0x1f0   :  { %1044 = vmatmul.mubr.f32.vlgmr.msra.gmra.mxu1 %v827_v42  ;;  %1629 = vmatprep.subr.mxu0 %v1125_v33 }
 0x1f1   :  { %v832_v49 = vmax.f32 %v823_v47, 0.0  ;;  %1554 = vmatpush3.msra.mxu1 %v1103_v45  ;;  %1630 = vmatpush3.msra.mxu0 %v1125_v33 }
 0x1f2   :  { %1555 = vmatprep.subr.mxu1 %v1118_v48  ;;  %1631 = vmatprep.subr.mxu0 %v1124_v34 }
 0x1f3   :  { %1556 = vmatpush3.msra.mxu1 %v1102_v57  ;;  %1048 = vmatprep.mubr.f32.mxu1 %v832_v49 }
 0x1f4   :  { %1557 = vmatprep.subr.mxu1 %v1117_v50  ;;  %1049 = vmatmul.mubr.f32.gmra.mxu1 %v831_v51 }
 0x1f5   :  { %1558 = vmatpush3.msra.mxu1 %v1101_v52  ;;  %1282 = vmatprep.mubr.f32.mxu1 %v578_v53 }
 0x1f6   :  { %1559 = vmatprep.subr.mxu1 %v1116_v54  ;;  %1632 = vmatpush3.msra.mxu0 %v1124_v34 }
 0x1f7   :  { %1560 = vmatpush3.msra.mxu1 %v1100_v55  ;;  %1633 = vmatprep.subr.mxu0 %v1123_v36 }
 0x1f8   :  { %1561 = vmatprep.subr.mxu1 %v1115_v59  ;;  %1634 = vmatpush3.msra.mxu0 %v1123_v36 }
 0x1f9   :  { %1562 = vmatpush3.msra.mxu1 %v1099_v60  ;;  %1635 = vmatprep.subr.mxu0 %v1122_v37 }
 0x1fa   :  { %1563 = vmatprep.subr.mxu1 %v1114_v0  ;;  %1636 = vmatpush3.msra.mxu0 %v1122_v37 }
 0x1fb   :  { %1564 = vmatpush3.msra.mxu1 %v1098_v63  ;;  %1637 = vmatprep.subr.mxu0 %v1121_v38 }
 0x1fc   :  { %1565 = vmatprep.subr.mxu1 %v1113_v61  ;;  %1638 = vmatpush3.msra.mxu0 %v1121_v38 }
 0x1fd   :  { %1566 = vmatpush3.msra.mxu1 %v1097_v1  ;;  %1639 = vmatprep.subr.mxu0 %v1120_v39 }
 0x1fe   :  { %1567 = vmatprep.subr.mxu1 %v1112_v2  ;;  %1640 = vmatpush3.msra.mxu0 %v1120_v39 }
 0x1ff   :  { %1568 = vmatpush3.msra.mxu1 %v1096_v3 }
 0x200   :  { %1569 = vmatprep.subr.mxu1 %v1111_v4 }
 0x201   :  { %1570 = vmatpush3.msra.mxu1 %v1095_v5 }
 0x202   :  { %1571 = vmatprep.subr.mxu1 %v1110_v6 }
 0x203   :  { %1572 = vmatpush3.msra.mxu1 %v1094_v7 }
 0x204   :  { %1573 = vmatprep.subr.mxu1 %v1109_v8  ;;  %v1471_v40 = vpop.f32.mrf.mxu0 }
 0x205   :  { %1574 = vmatpush3.msra.mxu1 %v1093_v9  ;;  %v1399_v9 = vld [vmem:[%s2049_s9] ss:$0 sm:$0xff] }
 0x206   :  { %1575 = vmatprep.subr.mxu1 %v1108_v10  ;;  %v1472_v41 = vpop.f32.mrf.mxu0 }
 0x207   :  { %1576 = vmatpush3.msra.mxu1 %v1092_v11  ;;  %v1473_v43 = vadd.f32 %v1472_v41, %v1471_v40 }
 0x208   :  { %1577 = vmatprep.subr.mxu1 %v1107_v12  ;;  %v1474_v42 = vpop.f32.mrf.mxu0 }
 0x209   :  { %1578 = vmatpush3.msra.mxu1 %v1091_v15  ;;  %v971_v48 = vadd.f32 %v1473_v43, %v1398_v44 }
 0x20a   :  { %1579 = vmatprep.subr.mxu1 %v1106_v16  ;;  %v1475_v46 = vpop.f32.mrf.mxu0 }
 0x20b   :  { %1580 = vmatpush3.msra.mxu1 %v1090_v17  ;;  %v1476_v57 = vadd.f32 %v1475_v46, %v1474_v42 }
 0x20c   :  { %1581 = vmatprep.subr.mxu1 %v1105_v18 }
 0x20d   :  { %1582 = vmatpush3.msra.mxu1 %v1089_v20  ;;  %v976_v53 = vadd.f32 %v1476_v57, %v1398_v44 }
 0x20e   :  { %1583 = vmatprep.subr.mxu1 %v1104_v22 }
 0x20f   :  { %1584 = vmatpush3.msra.mxu1 %v1088_v35 }
 0x210   :  { %1283 = vmatmul.mubr.f32.vlgmr.msra.gmra.mxu1 %v577_v14 }
 0x211   :  { %1287 = vmatprep.mubr.f32.mxu1 %v582_v24 }
 0x214   :  { %1288 = vmatmul.mubr.f32.gmra.mxu1 %v581_v26 }
 0x283   :  { %v1547_v0 = vpop.f32.mrf.mxu0 }
 0x285   :  { %v1548_v61 = vpop.f32.mrf.mxu0 }
 0x286   :  { %v1549_v7 = vadd.f32 %v1548_v61, %v1547_v0 }
 0x288   :  { %v1210_v12 = vadd.f32 %v1549_v7, %v1399_v9 }
 0x28c   :  { %v1550_v2 = vpop.f32.mrf.mxu0 }
 0x28e   :  { %v1551_v4 = vpop.f32.mrf.mxu0 }
 0x28f   :  { %v1552_v6 = vadd.f32 %v1551_v4, %v1550_v2 }
 0x291   :  { %v1215_v10 = vadd.f32 %v1552_v6, %v1399_v9 }
 0x2b0   :  { %v1509_v45 = vpop.f32.mrf.mxu1 }
 0x2b2   :  { %v1510_v47 = vpop.f32.mrf.mxu1 }
 0x2b3   :  { %v1511_v49 = vadd.f32 %v1510_v47, %v1509_v45 }
 0x2b4   :  { %v1512_v50 = vpop.f32.mrf.mxu1 }
 0x2b5   :  { %v1046_v51 = vadd.f32 %v1511_v49, %v971_v48 }
 0x2b6   :  { %v1513_v52 = vpop.f32.mrf.mxu1 }
 0x2b7   :  { %v1054_v54 = vmax.f32 %v1046_v51, 0.0  ;;  %v1514_v55 = vadd.f32 %v1513_v52, %v1512_v50 }
 0x2b9   :  { %v1051_v59 = vadd.f32 %v1514_v55, %v976_v53  ;;  %1641 = vmatprep.mubr.f32.mxu0 %v1054_v54 }
 0x2bb   :  { %v1055_v60 = vmax.f32 %v1051_v59, 0.0 }
 0x2bd   :  { %1642 = vmatmul.mubr.f32.vlgmr.msra.gmra.mxu0 %v1055_v60 }
 0x2d0   :  { %v1585_v63 = vpop.f32.mrf.mxu1 }
 0x2d2   :  { %v1586_v1 = vpop.f32.mrf.mxu1 }
 0x2d3   :  { %v1587_v11 = vadd.f32 %v1586_v1, %v1585_v63 }
 0x2d4   :  { %v1588_v3 = vpop.f32.mrf.mxu1 }
 0x2d5   :  { %v1285_v17 = vadd.f32 %v1587_v11, %v1210_v12 }
 0x2d6   :  { %v1589_v5 = vpop.f32.mrf.mxu1 }
 0x2d7   :  { %v1590_v8 = vadd.f32 %v1589_v5, %v1588_v3 }
 0x2d9   :  { %v1290_v13 = vadd.f32 %v1590_v8, %v1215_v10 }
 0x37d   :  { %v1643_v15 = vpop.f32.mrf.mxu0 }
 0x37e   :  { %v1365_v16 = vadd.f32 %v1643_v15, %v1290_v13 }
 0x37f   :  { %v1359_v18 = vpop.f32.mrf.mxu0 }
 0x380   :  { %1369 = vst [vmem:[#allocation13 + $0x8] sm:$0xff] %v1365_v16  ;;  %v1360_v19 = vadd.f32 %v1359_v18, %v1285_v17 }
 0x382   :  { %1368 = vst [vmem:[#allocation13] sm:$0xff] %v1360_v19 }
 0x383   :  { %1374 = vsyncadd [#allocation4], 224  ;;  %s1825_s12 = smov [#allocation13]  }
 0x384   :  { %s1375_s13 = sshll.u32 %s1825_s12, 4  ;;  %s1376_s13 = int_to_ptr.vmem [resolvable:$true] %s1375_s13 }
 0x385   :  { %s1781_s14 = scalar_lea.vmem %s1376_s13, 32  ;;  %s1785_s15 = scalar_lea.vmem %s1376_s13, 256 }
 0x386   :  { %p1782_p2 = scmp.ne.s32.totalorder %s1376_s13, %s1781_s14  ;;  %p1786_p3 = scmp.lt.s32.totalorder %s1376_s13, %s1376_s13 }
 0x387   :  { %p1787_p4 = scmp.lt.s32.totalorder %s1785_s15, %s1781_s14 }
 0x389   :  { %p1788_p5 = por %p1787_p4, %p1786_p3 }
 0x38b   :  { %p1789_p6 = pnand %p1788_p5, %p1782_p2 }
 0x38d   :  { %1792 = shalt.err (!%p1789_p6)
}
 0x38e   :  { %1381 = dma.vmem_to_hbm [thread:$0]  %s1376_s13, 32, %s2050_s10, [#allocation4], %s1815_s25, %s1815_s25, %s1816_s26  }
 0x38f   :  { %1809 = dma.done.wait [#allocation4], 256  }
 0x390   :  { %1810 = vsyncadd [#allocation4], 4294967040 }
 0x391   :  { %1385 = vsyncpa [#allocation3], 1 }
 0x392   :  { %1386 = vsyncpa [#allocation6], 1 }
 0x393   :  { %1387 = vsyncpa [#allocation9], 1 }
 0x394   :  { %1388 = vsyncpa [#allocation12], 1 }
 0x395   :  { %1389 = vsyncpa [#allocation4], 1 }

// kernel: tpu_custom_call.1
= control target key start
LH: loop header
LB: loop body
LE: loop exit
PB: predicated region body
PF: predicated region fallthrough
CT: control target
= control target key end

     0   :  { %15 = vsyncpa [#allocation3], 0  ;;  %s2040_s0 = inlined_call_operand.hbm [shape: bf16[2,4,256], index: 0, kind: input, shape index: {}]   ;;  %s2041_s1 = inlined_call_operand.hbm [shape: f32[2,128], index: 1, kind: input, shape index: {}]   ;;  %s2042_s2 = inlined_call_operand.hbm [shape: f32[4,512], index: 2, kind: input, shape index: {}]   ;;  %s2043_s3 = inlined_call_operand.vmem [shape: f32[1,512], index: 3, kind: input, shape index: {}]   ;;  %s2044_s4 = inlined_call_operand.hbm [shape: f32[128,512], index: 4, kind: input, shape index: {}]   ;;  %s2045_s5 = inlined_call_operand.vmem [shape: f32[1,512], index: 5, kind: input, shape index: {}]   ;;  %s2046_s6 = inlined_call_operand.hbm [shape: f32[512,128], index: 6, kind: input, shape index: {}]   ;;  %s2047_s7 = inlined_call_operand.vmem [shape: f32[1,128], index: 7, kind: input, shape index: {}]   ;;  %s2048_s8 = inlined_call_operand.hbm [shape: f32[640,128], index: 8, kind: input, shape index: {}]   ;;  %s2049_s9 = inlined_call_operand.vmem [shape: f32[1,128], index: 9, kind: input, shape index: {}]   ;;  %s2050_s10 = inlined_call_operand.hbm [shape: f32[2,128], index: 10, kind: output, shape index: {}]  }
   0x1   :  { %16 = vsyncpa [#allocation6], 0 }
   0x2   :  { %17 = vsyncpa [#allocation9], 0 }
   0x3   :  { %18 = vsyncpa [#allocation12], 0 }
   0x4   :  { %19 = vsyncpa [#allocation4], 0 }
   0x5   :  { %24 = vsyncadd [#allocation3], 896  ;;  %s1811_s13 = smov [#allocation2]  }
   0x6   :  { %s25_s14 = sshll.u32 %s1811_s13, 4  ;;  %s26_s14 = int_to_ptr.vmem [resolvable:$true] %s25_s14 }
   0x7   :  { %s1669_s15 = scalar_lea.vmem %s26_s14, 128  ;;  %s1673_s16 = scalar_lea.vmem %s26_s14, 1024 }
   0x8   :  { %p1670_p0 = scmp.ne.s32.totalorder %s26_s14, %s1669_s15  ;;  %p1674_p1 = scmp.lt.s32.totalorder %s26_s14, %s26_s14 }
   0x9   :  { %p1675_p2 = scmp.lt.s32.totalorder %s1673_s16, %s1669_s15 }
   0xb   :  { %p1676_p3 = por %p1675_p2, %p1674_p1 }
   0xd   :  { %p1677_p4 = pnand %p1676_p3, %p1670_p0 }
   0xf   :  { %1680 = shalt.err (!%p1677_p4)
}
  0x10   :  { %s1812_s17 = smov 64   ;;  %s1813_s18 = smov 4  }
  0x11   :  { %31 = dma.hbm_to_vmem [thread:$0]  %s2040_s0, 128, %s26_s14, [#allocation3], %s1812_s17, %s1812_s17, %s1813_s18  }
  0x12   :  { %36 = vsyncadd [#allocation6], 224  ;;  %s1814_s21 = smov [#allocation5]  }
  0x13   :  { %s37_s22 = sshll.u32 %s1814_s21, 4  ;;  %s38_s22 = int_to_ptr.vmem [resolvable:$true] %s37_s22 }
  0x14   :  { %s1689_s23 = scalar_lea.vmem %s38_s22, 32  ;;  %s1693_s24 = scalar_lea.vmem %s38_s22, 256 }
  0x15   :  { %p1690_p5 = scmp.ne.s32.totalorder %s38_s22, %s1689_s23  ;;  %p1694_p6 = scmp.lt.s32.totalorder %s38_s22, %s38_s22 }
  0x16   :  { %p1695_p7 = scmp.lt.s32.totalorder %s1693_s24, %s1689_s23 }
  0x18   :  { %p1696_p8 = por %p1695_p7, %p1694_p6 }
  0x1a   :  { %p1697_p9 = pnand %p1696_p8, %p1690_p5 }
  0x1c   :  { %1700 = shalt.err (!%p1697_p9)
}
  0x1d   :  { %s1815_s25 = smov 32   ;;  %s1816_s26 = smov 2  }
  0x1e   :  { %43 = dma.hbm_to_vmem [thread:$0]  %s2041_s1, 32, %s38_s22, [#allocation6], %s1815_s25, %s1815_s25, %s1816_s26  }
  0x1f   :  { %s1817_s0 = smov [#allocation8]  }
  0x20   :  { %s61_s29 = sshll.u32 %s1817_s0, 4  ;;  %s62_s29 = int_to_ptr.vmem [resolvable:$true] %s61_s29 }
  0x21   :  { %s1709_s30 = scalar_lea.vmem %s62_s29, 8192  ;;  %p1714_p11 = scmp.lt.s32.totalorder %s62_s29, %s62_s29 }
  0x22   :  { %p1710_p10 = scmp.ne.s32.totalorder %s62_s29, %s1709_s30  ;;  %p1715_p12 = scmp.lt.s32.totalorder %s1709_s30, %s1709_s30 }
  0x24   :  { %p1716_p13 = por %p1715_p12, %p1714_p11 }
  0x26   :  { %p1717_p0 = pnand %p1716_p13, %p1710_p10 }
  0x28   :  { %1720 = shalt.err (!%p1717_p0)
}
  0x29   :  { %s1818_s11 = smov 512   ;;  %s1819_s14 = smov [#allocation7]  }
  0x2a   :  { %67 = dma.hbm_to_vmem [thread:$0]  %s2044_s4, 8192, %s62_s29, [#allocation9], %s1818_s11, %s1818_s11, %s1815_s25  }
  0x2b   :  { %s50_s15 = sshll.u32 %s1819_s14, 4  ;;  %s1820_s1 = smov [#allocation10]   ;;  %s51_s15 = int_to_ptr.vmem [resolvable:$true] %s50_s15 }
  0x2c   :  { %s75_s16 = sshll.u32 %s1820_s1, 4  ;;  %s1729_s17 = scalar_lea.vmem %s51_s15, 256  ;;  %s76_s16 = int_to_ptr.vmem [resolvable:$true] %s75_s16 }
  0x2d   :  { %p1730_p1 = scmp.ne.s32.totalorder %s51_s15, %s1729_s17  ;;  %p1734_p2 = scmp.lt.s32.totalorder %s51_s15, %s51_s15 }
  0x2e   :  { %p1735_p3 = scmp.lt.s32.totalorder %s1729_s17, %s1729_s17 }
  0x30   :  { %p1736_p4 = por %p1735_p3, %p1734_p2 }
  0x32   :  { %p1737_p5 = pnand %p1736_p4, %p1730_p1 }
  0x34   :  { %1740 = shalt.err (!%p1737_p5)
}
  0x35   :  { %53 = dma.hbm_to_vmem [thread:$0]  %s2042_s2, 256, %s51_s15, [#allocation6]  }
  0x36   :  { %s1749_s20 = scalar_lea.vmem %s76_s16, 8192  ;;  %p1754_p7 = scmp.lt.s32.totalorder %s76_s16, %s76_s16 }
  0x37   :  { %p1750_p6 = scmp.ne.s32.totalorder %s76_s16, %s1749_s20  ;;  %p1755_p8 = scmp.lt.s32.totalorder %s1749_s20, %s1749_s20 }
  0x39   :  { %p1756_p9 = por %p1755_p8, %p1754_p7 }
  0x3b   :  { %p1757_p10 = pnand %p1756_p9, %p1750_p6 }
  0x3d   :  { %1760 = shalt.err (!%p1757_p10)
}
  0x3e   :  { %s1821_s4 = smov 128   ;;  %s1822_s21 = smov 8  }
  0x3f   :  { %81 = dma.hbm_to_vmem [thread:$0]  %s2046_s6, 8192, %s76_s16, [#allocation9], %s1821_s4, %s1821_s4, %s1822_s21  }
  0x40   :  { %s1823_s24 = smov [#allocation11]  }
  0x41   :  { %s89_s27 = sshll.u32 %s1823_s24, 4  ;;  %s90_s27 = int_to_ptr.vmem [resolvable:$true] %s89_s27 }
  0x42   :  { %s1769_s28 = scalar_lea.vmem %s90_s27, 10240  ;;  %p1774_p12 = scmp.lt.s32.totalorder %s90_s27, %s90_s27 }
  0x43   :  { %p1770_p11 = scmp.ne.s32.totalorder %s90_s27, %s1769_s28  ;;  %p1775_p13 = scmp.lt.s32.totalorder %s1769_s28, %s1769_s28 }
  0x45   :  { %p1776_p0 = por %p1775_p13, %p1774_p12 }
  0x47   :  { %p1777_p1 = pnand %p1776_p0, %p1770_p11 }
  0x49   :  { %1780 = shalt.err (!%p1777_p1)
}
  0x4a   :  { %95 = dma.hbm_to_vmem [thread:$0]  %s2048_s8, 10240, %s90_s27, [#allocation12], %s1821_s4, %s1821_s4, %s1822_s21  }
  0x4b   :  { %1801 = dma.done.wait [#allocation3], 1024  }
  0x4c   :  { %1802 = vsyncadd [#allocation3], 4294966272 }
  0x4d   :  { %1803 = dma.done.wait [#allocation6], 512  }
  0x4e   :  { %1804 = vsyncadd [#allocation6], 4294966784 }
  0x4f   :  { %1805 = dma.done.wait [#allocation9], 16384  }
  0x50   :  { %1806 = vsyncadd [#allocation9], 4294950912 }
  0x51   :  { %1807 = dma.done.wait [#allocation12], 10240  }
  0x52   :  { %1808 = vsyncadd [#allocation12], 4294957056  ;;  %v1824_v0 = vmov 0.0   ;;  %v1432_v1 = vld [vmem:[#allocation2 + $0x8] sm:$0xff]   ;;  %vm196_vm0 = vcmask 1043456   ;;  %v1401_v2 = vld [vmem:[#allocation2] sm:$0xff]  }
  0x53   :  { %735 = vmatprep.mubr.f32.mxu0 %v1824_v0  ;;  %485 = vmatprep.mubr.f32.mxu1 %v1824_v0  ;;  %v1433_v3 = vld [vmem:[#allocation2 + $0x10] sm:$0xff]   ;;  %v1406_v4 = vunpack.c.l.bf16 %v1432_v1  ;;  %v1402_v5 = vunpack.c.l.bf16 %v1401_v2  ;;  %v1407_v6 = vunpack.c.h.bf16 %v1432_v1  ;;  %v1403_v7 = vunpack.c.h.bf16 %v1401_v2  ;;  %v1435_v8 = vld [vmem:[#allocation2 + $0x20] sm:$0xff]   ;;  %v646_v12 = vld [vmem:[#allocation8 + $0x1e8] sm:$0xff] }
  0x54   :  { %v1411_v9 = vunpack.c.h.bf16 %v1433_v3  ;;  %v1410_v10 = vunpack.c.l.bf16 %v1433_v3  ;;  %v1419_v11 = vunpack.c.h.bf16 %v1435_v8  ;;  %671 = vmatprep.subr.mxu0 %v646_v12  ;;  %v645_v17 = vld [vmem:[#allocation8 + $0x1e0] sm:$0xff]  ;;  %v642_v18 = vld [vmem:[#allocation8 + $0x1c8] sm:$0xff]  ;;  %v1418_v23 = vunpack.c.l.bf16 %v1435_v8  ;;  %v1434_v37 = vld [vmem:[#allocation2 + $0x18] sm:$0xff]  }
  0x55   :  { %v166_v13 = vcombine.high %v1406_v4, %v1406_v4  ;;  %v207_v14 = vsel %vm196_vm0, %v1406_v4, 0.0  ;;  %v164_v15 = vcombine.high %v1402_v5, %v1402_v5  ;;  %v197_v16 = vsel %vm196_vm0, %v1402_v5, 0.0  ;;  %v641_v19 = vld [vmem:[#allocation8 + $0x1c0] sm:$0xff]  ;;  %672 = vmatpush1.msra.mxu0 %v645_v17  ;;  %v638_v24 = vld [vmem:[#allocation8 + $0x1a8] sm:$0xff]  ;;  %v1437_v62 = vld [vmem:[#allocation2 + $0x30] sm:$0xff]  }
  0x56   :  { %v167_v20 = vcombine.high %v1407_v6, %v1407_v6  ;;  %v212_v21 = vsel %vm196_vm0, %v1407_v6, 0.0  ;;  %v165_v22 = vcombine.high %v1403_v7, %v1403_v7  ;;  %v202_v27 = vsel %vm196_vm0, %v1403_v7, 0.0  ;;  %673 = vmatprep.subr.mxu0 %v642_v18  ;;  %v1436_v33 = vld [vmem:[#allocation2 + $0x28] sm:$0xff]   ;;  %v637_v34 = vld [vmem:[#allocation8 + $0x1a0] sm:$0xff] }
  0x57   :  { %v208_v25 = vsel %vm196_vm0, %v166_v13, 0.0  ;;  %v198_v26 = vsel %vm196_vm0, %v164_v15, 0.0  ;;  %v169_v28 = vcombine.high %v1411_v9, %v1411_v9  ;;  %674 = vmatpush1.msra.mxu0 %v641_v19  ;;  %v222_v35 = vsel %vm196_vm0, %v1411_v9, 0.0  ;;  %v634_v38 = vld [vmem:[#allocation8 + $0x188] sm:$0xff]  ;;  %v633_v43 = vld [vmem:[#allocation8 + $0x180] sm:$0xff]  ;;  %v1438_v13 = vld [vmem:[#allocation2 + $0x38] sm:$0xff]  }
  0x58   :  { %v209_v29 = vadd.f32 %v208_v25, %v207_v14  ;;  %v199_v30 = vadd.f32 %v198_v26, %v197_v16  ;;  %v213_v31 = vsel %vm196_vm0, %v167_v20, 0.0  ;;  %v203_v32 = vsel %vm196_vm0, %v165_v22, 0.0  ;;  %675 = vmatprep.subr.mxu0 %v638_v24  ;;  %v630_v49 = vld [vmem:[#allocation8 + $0x168] sm:$0xff]  ;;  %v629_v52 = vld [vmem:[#allocation8 + $0x160] sm:$0xff] }
  0x59   :  { %v168_v36 = vcombine.high %v1410_v10, %v1410_v10  ;;  %v214_v39 = vadd.f32 %v213_v31, %v212_v21  ;;  %v204_v40 = vadd.f32 %v203_v32, %v202_v27  ;;  %v223_v41 = vsel %vm196_vm0, %v169_v28, 0.0  ;;  %676 = vmatpush1.msra.mxu0 %v637_v34  ;;  %v626_v57 = vld [vmem:[#allocation8 + $0x148] sm:$0xff]  ;;  %v625_v63 = vld [vmem:[#allocation8 + $0x140] sm:$0xff] }
  0x5a   :  { %210 = vadd.xlane.f32.xlu1 %v209_v29  ;;  %200 = vadd.xlane.f32.xlu0 %v199_v30  ;;  %v173_v42 = vcombine.high %v1419_v11, %v1419_v11  ;;  %v217_v44 = vsel %vm196_vm0, %v1410_v10, 0.0  ;;  %v172_v46 = vcombine.high %v1418_v23, %v1418_v23  ;;  %v1422_v47 = vunpack.c.l.bf16 %v1436_v33  ;;  %v622_v3 = vld [vmem:[#allocation8 + $0x128] sm:$0xff]  ;;  %v621_v8 = vld [vmem:[#allocation8 + $0x120] sm:$0xff] }
  0x5b   :  { %v218_v45 = vsel %vm196_vm0, %v168_v36, 0.0  ;;  %v1414_v48 = vunpack.c.l.bf16 %v1434_v37  ;;  %677 = vmatprep.subr.mxu0 %v634_v38  ;;  %v224_v50 = vadd.f32 %v223_v41, %v222_v35  ;;  %v242_v51 = vsel %vm196_vm0, %v1419_v11, 0.0  ;;  %v618_v14 = vld [vmem:[#allocation8 + $0x108] sm:$0xff]  ;;  %v617_v17 = vld [vmem:[#allocation8 + $0x100] sm:$0xff] }
  0x5c   :  { %678 = vmatpush1.msra.mxu0 %v633_v43  ;;  %v219_v53 = vadd.f32 %v218_v45, %v217_v44  ;;  %v243_v54 = vsel %vm196_vm0, %v173_v42, 0.0  ;;  %v174_v55 = vcombine.high %v1422_v47, %v1422_v47  ;;  %v1423_v56 = vunpack.c.h.bf16 %v1436_v33  ;;  %v614_v22 = vld [vmem:[#allocation8 + $0xe8] sm:$0xff]  ;;  %v613_v27 = vld [vmem:[#allocation8 + $0xe0] sm:$0xff] }
  0x5d   :  { %v237_v58 = vsel %vm196_vm0, %v1418_v23, 0.0  ;;  %v238_v59 = vsel %vm196_vm0, %v172_v46, 0.0  ;;  %v170_v60 = vcombine.high %v1414_v48, %v1414_v48  ;;  %v1415_v61 = vunpack.c.h.bf16 %v1434_v37  ;;  %679 = vmatprep.subr.mxu0 %v630_v49  ;;  %v610_v28 = vld [vmem:[#allocation8 + $0xc8] sm:$0xff]  ;;  %v609_v33 = vld [vmem:[#allocation8 + $0xc0] sm:$0xff] }
  0x5e   :  { %215 = vadd.xlane.f32.xlu1 %v214_v39  ;;  %205 = vadd.xlane.f32.xlu0 %v204_v40  ;;  %v244_v1 = vadd.f32 %v243_v54, %v242_v51  ;;  %v247_v2 = vsel %vm196_vm0, %v1422_v47, 0.0  ;;  %v239_v4 = vadd.f32 %v238_v59, %v237_v58  ;;  %v248_v5 = vsel %vm196_vm0, %v174_v55, 0.0  ;;  %v606_v38 = vld [vmem:[#allocation8 + $0xa8] sm:$0xff]  ;;  %v605_v39 = vld [vmem:[#allocation8 + $0xa0] sm:$0xff]  ;;  %v277_v55 = vld [vmem:[#allocation7] sm:$0xff] }
  0x5f   :  { %680 = vmatpush1.msra.mxu0 %v629_v52  ;;  %v175_v6 = vcombine.high %v1423_v56, %v1423_v56  ;;  %v1426_v7 = vunpack.c.l.bf16 %v1437_v62  ;;  %v227_v9 = vsel %vm196_vm0, %v1414_v48, 0.0  ;;  %v228_v10 = vsel %vm196_vm0, %v170_v60, 0.0  ;;  %v602_v42 = vld [vmem:[#allocation8 + $0x88] sm:$0xff]  ;;  %v601_v47 = vld [vmem:[#allocation8 + $0x80] sm:$0xff] }
  0x60   :  { %681 = vmatprep.subr.mxu0 %v626_v57  ;;  %v171_v11 = vcombine.high %v1415_v61, %v1415_v61  ;;  %v1427_v12 = vunpack.c.h.bf16 %v1437_v62  ;;  %v249_v15 = vadd.f32 %v248_v5, %v247_v2  ;;  %v252_v16 = vsel %vm196_vm0, %v1423_v56, 0.0  ;;  %v598_v48 = vld [vmem:[#allocation8 + $0x68] sm:$0xff]  ;;  %v597_v51 = vld [vmem:[#allocation8 + $0x60] sm:$0xff]  ;;  %v1945_v62 = vld [vmem:[#allocation7 + $0x8] sm:$0xff] }
  0x61   :  { %682 = vmatpush1.msra.mxu0 %v625_v63  ;;  %v229_v18 = vadd.f32 %v228_v10, %v227_v9  ;;  %v253_v19 = vsel %vm196_vm0, %v175_v6, 0.0  ;;  %v232_v20 = vsel %vm196_vm0, %v1415_v61, 0.0  ;;  %v176_v21 = vcombine.high %v1426_v7, %v1426_v7  ;;  %v594_v52 = vld [vmem:[#allocation8 + $0x48] sm:$0xff]  ;;  %v589_v56 = vld [vmem:[#allocation8 + $0x20] sm:$0xff]  ;;  %v848_v2 = vld [vmem:[#allocation10 + $0x78] sm:$0xff] }
  0x62   :  { %225 = vadd.xlane.f32.xlu1 %v224_v50  ;;  %220 = vadd.xlane.f32.xlu0 %v219_v53  ;;  %v233_v23 = vsel %vm196_vm0, %v171_v11, 0.0  ;;  %v177_v24 = vcombine.high %v1427_v12, %v1427_v12  ;;  %v1430_v25 = vunpack.c.l.bf16 %v1438_v13  ;;  %v1431_v26 = vunpack.c.h.bf16 %v1438_v13  ;;  %v593_v53 = vld [vmem:[#allocation8 + $0x40] sm:$0xff]  ;;  %v590_v54 = vld [vmem:[#allocation8 + $0x28] sm:$0xff]  ;;  %v860_v9 = vld [vmem:[#allocation10 + $0xd8] sm:$0xff] }
  0x63   :  { %683 = vmatprep.subr.mxu0 %v622_v3  ;;  %v254_v29 = vadd.f32 %v253_v19, %v252_v16  ;;  %v234_v30 = vadd.f32 %v233_v23, %v232_v20  ;;  %v257_v31 = vsel %vm196_vm0, %v1426_v7, 0.0  ;;  %v262_v32 = vsel %vm196_vm0, %v1427_v12, 0.0  ;;  %v586_v58 = vld [vmem:[#allocation8 + $0x8] sm:$0xff]  ;;  %v585_v59 = vld [vmem:[#allocation8] sm:$0xff]  ;;  %v863_v3 = vld [vmem:[#allocation10 + $0xf0] sm:$0xff] }
  0x64   :  { %684 = vmatpush1.msra.mxu0 %v621_v8  ;;  %v258_v34 = vsel %vm196_vm0, %v176_v21, 0.0  ;;  %v263_v35 = vsel %vm196_vm0, %v177_v24, 0.0  ;;  %v178_v36 = vcombine.high %v1430_v25, %v1430_v25  ;;  %v179_v37 = vcombine.high %v1431_v26, %v1431_v26  ;;  %v1938_v60 = vld [vmem:[#allocation5] sm:$0xff]  ;;  %v1943_v61 = vld [vmem:[#allocation5 + $0x8] sm:$0xff]  ;;  %v844_v10 = vld [vmem:[#allocation10 + $0x58] sm:$0xff] }
  0x65   :  { %685 = vmatprep.subr.mxu0 %v618_v14  ;;  %v259_v40 = vadd.f32 %v258_v34, %v257_v31  ;;  %v264_v41 = vadd.f32 %v263_v35, %v262_v32  ;;  %v267_v43 = vsel %vm196_vm0, %v1430_v25, 0.0  ;;  %v272_v45 = vsel %vm196_vm0, %v1431_v26, 0.0  ;;  %v862_v5 = vld [vmem:[#allocation10 + $0xe8] sm:$0xff]  ;;  %v861_v7 = vld [vmem:[#allocation10 + $0xe0] sm:$0xff]  ;;  %v859_v11 = vld [vmem:[#allocation10 + $0xd0] sm:$0xff] }
  0x66   :  { %245 = vadd.xlane.f32.xlu1 %v244_v1  ;;  %240 = vadd.xlane.f32.xlu0 %v239_v4  ;;  %v268_v44 = vsel %vm196_vm0, %v178_v36, 0.0  ;;  %v273_v46 = vsel %vm196_vm0, %v179_v37, 0.0  ;;  %v406_v57 = vcombine.high %v277_v55, %v277_v55  ;;  %v407_v63 = vcombine.high %v1945_v62, %v1945_v62  ;;  %v864_v1 = vld [vmem:[#allocation10 + $0xf8] sm:$0xff]  ;;  %v847_v4 = vld [vmem:[#allocation10 + $0x70] sm:$0xff]  ;;  %v846_v6 = vld [vmem:[#allocation10 + $0x68] sm:$0xff] }
  0x67   :  { %686 = vmatpush1.msra.mxu0 %v617_v17  ;;  %v269_v49 = vadd.f32 %v268_v44, %v267_v43  ;;  %v274_v50 = vadd.f32 %v273_v46, %v272_v45  ;;  %v845_v8 = vld [vmem:[#allocation10 + $0x60] sm:$0xff]  ;;  %v843_v12 = vld [vmem:[#allocation10 + $0x50] sm:$0xff]  ;;  %v858_v13 = vld [vmem:[#allocation10 + $0xc8] sm:$0xff]  ;;  %v281_v34 = vlaneseq  ;;  %vm383_vm1 = vcmask 1041409  }
  0x68   :  { %687 = vmatprep.subr.mxu0 %v614_v22  ;;  %1390 = vmatprep.subr.msk.mxu1 %vm196_vm0, %v406_v57  ;;  %v842_v14 = vld [vmem:[#allocation10 + $0x48] sm:$0xff]  ;;  %v841_v16 = vld [vmem:[#allocation10 + $0x40] sm:$0xff]  ;;  %v856_v17 = vld [vmem:[#allocation10 + $0xb8] sm:$0xff]  ;;  %vm385_vm2 = vcmask 1042434   ;;  %vm387_vm3 = vcmask 1043459   ;;  %vm389_vm4 = vcmask 1044484  }
  0x69   :  { %688 = vmatpush1.msra.mxu0 %v613_v27  ;;  %1391 = vmatpush1.msk.msra.mxu1 %vm196_vm0, %v277_v55  ;;  %v855_v19 = vld [vmem:[#allocation10 + $0xb0] sm:$0xff]  ;;  %v854_v21 = vld [vmem:[#allocation10 + $0xa8] sm:$0xff]  ;;  %v853_v23 = vld [vmem:[#allocation10 + $0xa0] sm:$0xff]  ;;  %v1951_v35 = vshrl.u32 %v281_v34, 7  ;;  %v318_v36 = vand.u32 127, %v281_v34  ;;  %vm391_vm5 = vcmask 1045509  }
  0x6a   :  { %250 = vadd.xlane.f32.xlu1 %v249_v15  ;;  %230 = vadd.xlane.f32.xlu0 %v229_v18  ;;  %v857_v15 = vld [vmem:[#allocation10 + $0xc0] sm:$0xff]  ;;  %v840_v18 = vld [vmem:[#allocation10 + $0x38] sm:$0xff]  ;;  %v839_v20 = vld [vmem:[#allocation10 + $0x30] sm:$0xff]  ;;  %vm393_vm6 = vcmask 1046534   ;;  %vm395_vm7 = vcmask 1047559   ;;  %vm408_vm8 = vcmask 31744  }
  0x6b   :  { %689 = vmatprep.subr.mxu0 %v610_v28  ;;  %1394 = vmatprep.subr.msk.mxu1 %vm196_vm0, %v407_v63  ;;  %v838_v22 = vld [vmem:[#allocation10 + $0x28] sm:$0xff]  ;;  %v837_v24 = vld [vmem:[#allocation10 + $0x20] sm:$0xff]  ;;  %v852_v25 = vld [vmem:[#allocation10 + $0x98] sm:$0xff] }
  0x6c   :  { %690 = vmatpush1.msra.mxu0 %v609_v33  ;;  %v836_v26 = vld [vmem:[#allocation10 + $0x18] sm:$0xff]  ;;  %v851_v27 = vld [vmem:[#allocation10 + $0x90] sm:$0xff]  ;;  %v849_v31 = vld [vmem:[#allocation10 + $0x80] sm:$0xff] }
  0x6d   :  { %691 = vmatprep.subr.mxu0 %v606_v38  ;;  %v835_v28 = vld [vmem:[#allocation10 + $0x10] sm:$0xff]  ;;  %v833_v32 = vld [vmem:[#allocation10] sm:$0xff]  ;;  %v1087_v33 = vld [vmem:[#allocation11 + $0xf8] sm:$0xff] }
  0x6e   :  { %255 = vadd.xlane.f32.xlu1 %v254_v29  ;;  %235 = vadd.xlane.f32.xlu0 %v234_v30  ;;  %v850_v29 = vld [vmem:[#allocation10 + $0x88] sm:$0xff]  ;;  %v627_v34 = vld [vmem:[#allocation8 + $0x150] sm:$0xff] }
  0x6f   :  { %692 = vmatpush1.msra.mxu0 %v605_v39  ;;  %v834_v30 = vld [vmem:[#allocation10 + $0x8] sm:$0xff]  ;;  %v321_v39 = vsub.s32 %v318_v36, %v1951_v35  ;;  %v624_v36 = vld [vmem:[#allocation8 + $0x138] sm:$0xff] }
  0x70   :  { %693 = vmatprep.subr.mxu0 %v602_v42 }
  0x71   :  { %694 = vmatpush1.msra.mxu0 %v601_v47 }
  0x72   :  { %260 = vadd.xlane.f32.xlu0 %v259_v40  ;;  %265 = vadd.xlane.f32.xlu1 %v264_v41 }
  0x73   :  { %695 = vmatprep.subr.mxu0 %v598_v48 }
  0x74   :  { %696 = vmatpush1.msra.mxu0 %v597_v51 }
  0x75   :  { %697 = vmatprep.subr.mxu0 %v594_v52 }
  0x76   :  { %270 = vadd.xlane.f32.xlu0 %v269_v49  ;;  %275 = vadd.xlane.f32.xlu1 %v274_v50 }
  0x77   :  { %698 = vmatpush1.msra.mxu0 %v593_v53 }
  0x78   :  { %699 = vmatprep.subr.mxu0 %v590_v54 }
  0x79   :  { %700 = vmatpush1.msra.mxu0 %v589_v56 }
  0x7a   :  { %701 = vmatprep.subr.mxu0 %v586_v58 }
  0x7b   :  { %702 = vmatpush1.msra.mxu0 %v585_v59 }
  0x7c   :  { %736 = vmatmul.mubr.f32.vlgmr.msra.gmra.mxu0 %v1938_v60  ;;  %1439 = vmatprep.subr.mxu0 %v864_v1 }
  0x7d   :  { %741 = vmatprep.mubr.f32.mxu0 %v1824_v0  ;;  %1440 = vmatpush3.msra.mxu0 %v848_v2 }
  0x7e   :  { %1441 = vmatprep.subr.mxu0 %v863_v3 }
  0x7f   :  { %1442 = vmatpush3.msra.mxu0 %v847_v4 }
  0x80   :  { %742 = vmatmul.mubr.f32.gmra.mxu0 %v1943_v61  ;;  %1443 = vmatprep.subr.mxu0 %v862_v5 }
  0x81   :  { %1444 = vmatpush3.msra.mxu0 %v846_v6 }
  0x82   :  { %1445 = vmatprep.subr.mxu0 %v861_v7 }
  0x83   :  { %1446 = vmatpush3.msra.mxu0 %v845_v8 }
  0x84   :  { %1447 = vmatprep.subr.mxu0 %v860_v9  ;;  %v648_v9 = vld [vmem:[#allocation8 + $0x1f8] sm:$0xff] }
  0x85   :  { %1448 = vmatpush3.msra.mxu0 %v844_v10 }
  0x86   :  { %1449 = vmatprep.subr.mxu0 %v859_v11 }
  0x87   :  { %1450 = vmatpush3.msra.mxu0 %v843_v12 }
  0x88   :  { %1451 = vmatprep.subr.mxu0 %v858_v13 }
  0x89   :  { %1452 = vmatpush3.msra.mxu0 %v842_v14 }
  0x8a   :  { %1453 = vmatprep.subr.mxu0 %v857_v15 }
  0x8b   :  { %1454 = vmatpush3.msra.mxu0 %v841_v16 }
  0x8c   :  { %1455 = vmatprep.subr.mxu0 %v856_v17 }
  0x8d   :  { %1456 = vmatpush3.msra.mxu0 %v840_v18 }
  0x8e   :  { %1457 = vmatprep.subr.mxu0 %v855_v19 }
  0x8f   :  { %1458 = vmatpush3.msra.mxu0 %v839_v20 }
  0x90   :  { %1459 = vmatprep.subr.mxu0 %v854_v21 }
  0x91   :  { %1460 = vmatpush3.msra.mxu0 %v838_v22 }
  0x92   :  { %1461 = vmatprep.subr.mxu0 %v853_v23 }
  0x93   :  { %1462 = vmatpush3.msra.mxu0 %v837_v24 }
  0x94   :  { %1463 = vmatprep.subr.mxu0 %v852_v25  ;;  %v644_v25 = vld [vmem:[#allocation8 + $0x1d8] sm:$0xff] }
  0x95   :  { %1464 = vmatpush3.msra.mxu0 %v836_v26  ;;  %v643_v26 = vld [vmem:[#allocation8 + $0x1d0] sm:$0xff] }
  0x96   :  { %1465 = vmatprep.subr.mxu0 %v851_v27  ;;  %v640_v27 = vld [vmem:[#allocation8 + $0x1b8] sm:$0xff] }
  0x97   :  { %1466 = vmatpush3.msra.mxu0 %v835_v28  ;;  %v639_v28 = vld [vmem:[#allocation8 + $0x1b0] sm:$0xff] }
  0x98   :  { %1467 = vmatprep.subr.mxu0 %v850_v29  ;;  %v636_v29 = vld [vmem:[#allocation8 + $0x198] sm:$0xff] }
  0x99   :  { %1468 = vmatpush3.msra.mxu0 %v834_v30  ;;  %v635_v30 = vld [vmem:[#allocation8 + $0x190] sm:$0xff] }
  0x9a   :  { %1469 = vmatprep.subr.mxu0 %v849_v31  ;;  %v632_v31 = vld [vmem:[#allocation8 + $0x178] sm:$0xff] }
  0x9b   :  { %1470 = vmatpush3.msra.mxu0 %v833_v32  ;;  %v631_v32 = vld [vmem:[#allocation8 + $0x170] sm:$0xff] }
  0x9c   :  { %1515 = vmatprep.subr.mxu0 %v1087_v33  ;;  %v628_v33 = vld [vmem:[#allocation8 + $0x158] sm:$0xff] }
  0xe3   :  { %v211_v37 = vpop.xlane.xlu1 %210  ;;  %v201_v38 = vpop.xlane.xlu0 %200 }
  0xe4   :  { %v322_v43 = vrot.slane %v201_v38, %v321_v39  ;;  %v330_v47 = vrot.slane %v211_v37, %v321_v39  ;;  %v623_v37 = vld [vmem:[#allocation8 + $0x130] sm:$0xff]  ;;  %v620_v38 = vld [vmem:[#allocation8 + $0x118] sm:$0xff] }
  0xe7   :  { %v216_v40 = vpop.xlane.xlu1 %215  ;;  %v206_v41 = vpop.xlane.xlu0 %205 }
  0xe8   :  { %v326_v42 = vrot.slane %v206_v41, %v321_v39  ;;  %v334_v48 = vrot.slane %v216_v40, %v321_v39  ;;  %v616_v40 = vld [vmem:[#allocation8 + $0xf8] sm:$0xff]  ;;  %v615_v41 = vld [vmem:[#allocation8 + $0xf0] sm:$0xff] }
  0xea   :  { %v384_v46 = vsel %vm383_vm1, %v326_v42, %v322_v43  ;;  %v612_v42 = vld [vmem:[#allocation8 + $0xd8] sm:$0xff]  ;;  %v611_v43 = vld [vmem:[#allocation8 + $0xd0] sm:$0xff] }
  0xeb   :  { %v226_v44 = vpop.xlane.xlu1 %225  ;;  %v221_v45 = vpop.xlane.xlu0 %220  ;;  %v386_v49 = vsel %vm385_vm2, %v330_v47, %v384_v46  ;;  %v604_v46 = vld [vmem:[#allocation8 + $0x98] sm:$0xff]  ;;  %v603_v47 = vld [vmem:[#allocation8 + $0x90] sm:$0xff] }
  0xec   :  { %v338_v52 = vrot.slane %v221_v45, %v321_v39  ;;  %v388_v53 = vsel %vm387_vm3, %v334_v48, %v386_v49  ;;  %v342_v56 = vrot.slane %v226_v44, %v321_v39  ;;  %v608_v44 = vld [vmem:[#allocation8 + $0xb8] sm:$0xff]  ;;  %v607_v45 = vld [vmem:[#allocation8 + $0xb0] sm:$0xff] }
  0xed   :  { %v600_v48 = vld [vmem:[#allocation8 + $0x78] sm:$0xff]  ;;  %v599_v49 = vld [vmem:[#allocation8 + $0x70] sm:$0xff] }
  0xee   :  { %v390_v57 = vsel %vm389_vm4, %v338_v52, %v388_v53  ;;  %v592_v52 = vld [vmem:[#allocation8 + $0x38] sm:$0xff]  ;;  %v591_v53 = vld [vmem:[#allocation8 + $0x30] sm:$0xff] }
  0xef   :  { %v246_v50 = vpop.xlane.xlu1 %245  ;;  %v241_v51 = vpop.xlane.xlu0 %240  ;;  %v392_v4 = vsel %vm391_vm5, %v342_v56, %v390_v57  ;;  %v283_v56 = vsub.s32 0, %v1951_v35  ;;  %v1985_v57 = vld [vmem:[%s2045_s5] sm:$0xf] }
  0xf0   :  { %v358_v59 = vrot.slane %v246_v50, %v321_v39  ;;  %v354_v63 = vrot.slane %v241_v51, %v321_v39  ;;  %v596_v50 = vld [vmem:[#allocation8 + $0x58] sm:$0xff]  ;;  %v595_v51 = vld [vmem:[#allocation8 + $0x50] sm:$0xff] }
  0xf2   :  { %v397_v10 = vsel %vm383_vm1, %v358_v59, %v354_v63  ;;  %v654_v59 = vrot.slane %v1985_v57, %v283_v56 }
  0xf3   :  { %v251_v54 = vpop.xlane.xlu1 %250  ;;  %v231_v55 = vpop.xlane.xlu0 %230 }
  0xf4   :  { %v346_v58 = vrot.slane %v231_v55, %v321_v39  ;;  %v362_v3 = vrot.slane %v251_v54, %v321_v39  ;;  %v588_v54 = vld [vmem:[#allocation8 + $0x18] sm:$0xff]  ;;  %v587_v55 = vld [vmem:[#allocation8 + $0x10] sm:$0xff] }
  0xf6   :  { %v394_v6 = vsel %vm393_vm6, %v346_v58, %v392_v4  ;;  %v398_v13 = vsel %vm385_vm2, %v362_v3, %v397_v10  ;;  %v287_v58 = vsub.s32 1, %v1951_v35  ;;  %v1070_v10 = vld [vmem:[#allocation11 + $0x70] sm:$0xff] }
  0xf7   :  { %v256_v1 = vpop.xlane.xlu1 %255  ;;  %v236_v2 = vpop.xlane.xlu0 %235 }
  0xf8   :  { %v350_v5 = vrot.slane %v236_v2, %v321_v39  ;;  %v366_v7 = vrot.slane %v256_v1, %v321_v39 }
  0xfa   :  { %v396_v8 = vsel %vm395_vm7, %v350_v5, %v394_v6  ;;  %v399_v15 = vsel %vm387_vm3, %v366_v7, %v398_v13  ;;  %v1071_v6 = vld [vmem:[#allocation11 + $0x78] sm:$0xff] }
  0xfb   :  { %1392 = vmatmul.mubr.msk.f32.vlgmr.msra.gmra.mxu1 %vm408_vm8, %v396_v8  ;;  %v261_v11 = vpop.xlane.xlu0 %260  ;;  %v266_v12 = vpop.xlane.xlu1 %265 }
  0xfc   :  { %v370_v14 = vrot.slane %v261_v11, %v321_v39  ;;  %1395 = vmatpush1.msk.msra.mxu1 %vm196_vm0, %v1945_v62  ;;  %491 = vmatprep.mubr.f32.mxu1 %v1824_v0  ;;  %v374_v16 = vrot.slane %v266_v12, %v321_v39  ;;  %v647_v62 = vld [vmem:[#allocation8 + $0x1f0] sm:$0xff]  ;;  %v1085_v12 = vld [vmem:[#allocation11 + $0xe8] sm:$0xff] }
  0xfd   :  { %748 = vmatprep.subr.mxu1 %v648_v9 }
  0xfe   :  { %v400_v17 = vsel %vm389_vm4, %v370_v14, %v399_v15  ;;  %v1069_v14 = vld [vmem:[#allocation11 + $0x68] sm:$0xff]  ;;  %v1084_v15 = vld [vmem:[#allocation11 + $0xe0] sm:$0xff] }
  0xff   :  { %v271_v18 = vpop.xlane.xlu0 %270  ;;  %v276_v19 = vpop.xlane.xlu1 %275  ;;  %v401_v22 = vsel %vm391_vm5, %v374_v16, %v400_v17  ;;  %v1068_v16 = vld [vmem:[#allocation11 + $0x60] sm:$0xff]  ;;  %v1083_v17 = vld [vmem:[#allocation11 + $0xd8] sm:$0xff] }
 0x100   :  { %v378_v20 = vrot.slane %v271_v18, %v321_v39  ;;  %v382_v21 = vrot.slane %v276_v19, %v321_v39  ;;  %v619_v39 = vld [vmem:[#allocation8 + $0x110] sm:$0xff]  ;;  %v1067_v18 = vld [vmem:[#allocation11 + $0x58] sm:$0xff] }
 0x101   :  { %v1082_v19 = vld [vmem:[#allocation11 + $0xd0] sm:$0xff] }
 0x102   :  { %v402_v23 = vsel %vm393_vm6, %v378_v20, %v401_v22  ;;  %v1066_v20 = vld [vmem:[#allocation11 + $0x50] sm:$0xff]  ;;  %v896_v22 = vld [vmem:[#allocation10 + $0x1f8] sm:$0xff] }
 0x103   :  { %v403_v24 = vsel %vm395_vm7, %v382_v21, %v402_v23  ;;  %v1081_v21 = vld [vmem:[#allocation11 + $0xc8] sm:$0xff] }
 0x104   :  { %1393 = vmatmul.mubr.msk.f32.gmra.mxu1 %vm408_vm8, %v403_v24  ;;  %v1065_v23 = vld [vmem:[#allocation11 + $0x48] sm:$0xff] }
 0x105   :  { %562 = vmatprep.mubr.f32.mxu1 %v1824_v0 }
 0x108   :  { %1396 = vmatmul.mubr.msk.f32.vlgmr.msra.gmra.mxu1 %vm408_vm8, %v396_v8  ;;  %v1086_v8 = vld [vmem:[#allocation11 + $0xf0] sm:$0xff] }
 0x109   :  { %749 = vmatpush1.msra.mxu1 %v647_v62  ;;  %568 = vmatprep.mubr.f32.mxu1 %v1824_v0  ;;  %v1080_v62 = vld [vmem:[#allocation11 + $0xc0] sm:$0xff] }
 0x10a   :  { %750 = vmatprep.subr.mxu1 %v644_v25  ;;  %v1064_v25 = vld [vmem:[#allocation11 + $0x40] sm:$0xff] }
 0x10b   :  { %751 = vmatpush1.msra.mxu1 %v643_v26  ;;  %v895_v26 = vld [vmem:[#allocation10 + $0x1f0] sm:$0xff] }
 0x10c   :  { %752 = vmatprep.subr.mxu1 %v640_v27  ;;  %1397 = vmatmul.mubr.msk.f32.gmra.mxu1 %vm408_vm8, %v403_v24  ;;  %v880_v24 = vld [vmem:[#allocation10 + $0x178] sm:$0xff]  ;;  %v879_v27 = vld [vmem:[#allocation10 + $0x170] sm:$0xff] }
 0x10d   :  { %753 = vmatpush1.msra.mxu1 %v639_v28  ;;  %812 = vmatprep.mubr.f32.mxu1 %v1824_v0  ;;  %v894_v28 = vld [vmem:[#allocation10 + $0x1e8] sm:$0xff] }
 0x10e   :  { %754 = vmatprep.subr.mxu1 %v636_v29  ;;  %v878_v29 = vld [vmem:[#allocation10 + $0x168] sm:$0xff] }
 0x10f   :  { %755 = vmatpush1.msra.mxu1 %v635_v30  ;;  %v1079_v30 = vld [vmem:[#allocation11 + $0xb8] sm:$0xff] }
 0x110   :  { %756 = vmatprep.subr.mxu1 %v632_v31  ;;  %v893_v31 = vld [vmem:[#allocation10 + $0x1e0] sm:$0xff] }
 0x111   :  { %757 = vmatpush1.msra.mxu1 %v631_v32  ;;  %v1063_v32 = vld [vmem:[#allocation11 + $0x38] sm:$0xff] }
 0x112   :  { %758 = vmatprep.subr.mxu1 %v628_v33  ;;  %v877_v33 = vld [vmem:[#allocation10 + $0x160] sm:$0xff] }
 0x113   :  { %759 = vmatpush1.msra.mxu1 %v627_v34  ;;  %v1078_v34 = vld [vmem:[#allocation11 + $0xb0] sm:$0xff] }
 0x114   :  { %760 = vmatprep.subr.mxu1 %v624_v36  ;;  %v892_v36 = vld [vmem:[#allocation10 + $0x1d8] sm:$0xff] }
 0x115   :  { %761 = vmatpush1.msra.mxu1 %v623_v37  ;;  %v1062_v37 = vld [vmem:[#allocation11 + $0x30] sm:$0xff] }
 0x116   :  { %762 = vmatprep.subr.mxu1 %v620_v38  ;;  %v876_v38 = vld [vmem:[#allocation10 + $0x158] sm:$0xff] }
 0x117   :  { %763 = vmatpush1.msra.mxu1 %v619_v39  ;;  %v1077_v39 = vld [vmem:[#allocation11 + $0xa8] sm:$0xff] }
 0x118   :  { %764 = vmatprep.subr.mxu1 %v616_v40  ;;  %v891_v40 = vld [vmem:[#allocation10 + $0x1d0] sm:$0xff] }
 0x119   :  { %765 = vmatpush1.msra.mxu1 %v615_v41  ;;  %v1061_v41 = vld [vmem:[#allocation11 + $0x28] sm:$0xff] }
 0x11a   :  { %766 = vmatprep.subr.mxu1 %v612_v42  ;;  %v875_v42 = vld [vmem:[#allocation10 + $0x150] sm:$0xff] }
 0x11b   :  { %767 = vmatpush1.msra.mxu1 %v611_v43  ;;  %v1076_v43 = vld [vmem:[#allocation11 + $0xa0] sm:$0xff] }
 0x11c   :  { %768 = vmatprep.subr.mxu1 %v608_v44  ;;  %v890_v44 = vld [vmem:[#allocation10 + $0x1c8] sm:$0xff] }
 0x11d   :  { %769 = vmatpush1.msra.mxu1 %v607_v45  ;;  %v1060_v45 = vld [vmem:[#allocation11 + $0x20] sm:$0xff] }
 0x11e   :  { %770 = vmatprep.subr.mxu1 %v604_v46  ;;  %v874_v46 = vld [vmem:[#allocation10 + $0x148] sm:$0xff] }
 0x11f   :  { %771 = vmatpush1.msra.mxu1 %v603_v47  ;;  %v1075_v47 = vld [vmem:[#allocation11 + $0x98] sm:$0xff] }
 0x120   :  { %772 = vmatprep.subr.mxu1 %v600_v48  ;;  %v889_v48 = vld [vmem:[#allocation10 + $0x1c0] sm:$0xff] }
 0x121   :  { %773 = vmatpush1.msra.mxu1 %v599_v49  ;;  %v1059_v49 = vld [vmem:[#allocation11 + $0x18] sm:$0xff] }
 0x122   :  { %774 = vmatprep.subr.mxu1 %v596_v50  ;;  %v873_v50 = vld [vmem:[#allocation10 + $0x140] sm:$0xff] }
 0x123   :  { %775 = vmatpush1.msra.mxu1 %v595_v51  ;;  %v1074_v51 = vld [vmem:[#allocation11 + $0x90] sm:$0xff] }
 0x124   :  { %776 = vmatprep.subr.mxu1 %v592_v52  ;;  %v888_v52 = vld [vmem:[#allocation10 + $0x1b8] sm:$0xff] }
 0x125   :  { %777 = vmatpush1.msra.mxu1 %v591_v53  ;;  %v1058_v53 = vld [vmem:[#allocation11 + $0x10] sm:$0xff] }
 0x126   :  { %778 = vmatprep.subr.mxu1 %v588_v54  ;;  %v872_v54 = vld [vmem:[#allocation10 + $0x138] sm:$0xff] }
 0x127   :  { %779 = vmatpush1.msra.mxu1 %v587_v55  ;;  %v1073_v55 = vld [vmem:[#allocation11 + $0x88] sm:$0xff] }
 0x128   :  { %813 = vmatmul.mubr.f32.vlgmr.msra.gmra.mxu1 %v1938_v60  ;;  %v658_v60 = vrot.slane %v1985_v57, %v287_v58  ;;  %1477 = vmatprep.subr.mxu1 %v896_v22 }
 0x129   :  { %818 = vmatprep.mubr.f32.mxu1 %v1824_v0  ;;  %1478 = vmatpush3.msra.mxu1 %v880_v24 }
 0x12a   :  { %1479 = vmatprep.subr.mxu1 %v895_v26 }
 0x12b   :  { %1480 = vmatpush3.msra.mxu1 %v879_v27 }
 0x12c   :  { %819 = vmatmul.mubr.f32.gmra.mxu1 %v1943_v61  ;;  %1481 = vmatprep.subr.mxu1 %v894_v28 }
 0x12d   :  { %1482 = vmatpush3.msra.mxu1 %v878_v29  ;;  %v291_v29 = vsub.s32 2, %v1951_v35 }
 0x12e   :  { %1483 = vmatprep.subr.mxu1 %v893_v31 }
 0x12f   :  { %1484 = vmatpush3.msra.mxu1 %v877_v33 }
 0x130   :  { %1485 = vmatprep.subr.mxu1 %v892_v36 }
 0x131   :  { %1486 = vmatpush3.msra.mxu1 %v876_v38 }
 0x132   :  { %1487 = vmatprep.subr.mxu1 %v891_v40 }
 0x133   :  { %1488 = vmatpush3.msra.mxu1 %v875_v42 }
 0x134   :  { %1489 = vmatprep.subr.mxu1 %v890_v44 }
 0x135   :  { %1490 = vmatpush3.msra.mxu1 %v874_v46 }
 0x136   :  { %1491 = vmatprep.subr.mxu1 %v889_v48  ;;  %v1118_v48 = vld [vmem:[#allocation11 + $0x1f0] sm:$0xff] }
 0x137   :  { %1492 = vmatpush3.msra.mxu1 %v873_v50  ;;  %v1117_v50 = vld [vmem:[#allocation11 + $0x1e8] sm:$0xff] }
 0x138   :  { %1493 = vmatprep.subr.mxu1 %v888_v52  ;;  %v1101_v52 = vld [vmem:[#allocation11 + $0x168] sm:$0xff] }
 0x139   :  { %1494 = vmatpush3.msra.mxu1 %v872_v54  ;;  %v1116_v54 = vld [vmem:[#allocation11 + $0x1e0] sm:$0xff] }
 0x13c   :  { %v737_v0 = vpop.f32.mrf.mxu0 }
 0x13d   :  { %v738_v63 = vadd.f32 %v737_v0, %v654_v59  ;;  %v871_v0 = vld [vmem:[#allocation10 + $0x130] sm:$0xff] }
 0x13e   :  { %v739_v61 = vpop.f32.mrf.mxu0 }
 0x13f   :  { %v740_v1 = vadd.f32 %v739_v61, %v658_v60  ;;  %v825_v2 = vmax.f32 %v738_v63, 0.0  ;;  %v1072_v63 = vld [vmem:[#allocation11 + $0x80] sm:$0xff]  ;;  %v886_v61 = vld [vmem:[#allocation10 + $0x1a8] sm:$0xff] }
 0x140   :  { %v743_v3 = vpop.f32.mrf.mxu0 }
 0x141   :  { %v826_v4 = vmax.f32 %v740_v1, 0.0  ;;  %v744_v5 = vadd.f32 %v743_v3, %v654_v59  ;;  %v887_v59 = vld [vmem:[#allocation10 + $0x1b0] sm:$0xff]  ;;  %v1056_v1 = vld [vmem:[#allocation11] sm:$0xff] }
 0x142   :  { %v745_v7 = vpop.f32.mrf.mxu0  ;;  %1495 = vmatprep.subr.mxu1 %v887_v59  ;;  %v885_v3 = vld [vmem:[#allocation10 + $0x1a0] sm:$0xff]  ;;  %v1115_v59 = vld [vmem:[#allocation11 + $0x1d8] sm:$0xff] }
 0x143   :  { %968 = vmatprep.mubr.f32.mxu0 %v826_v4  ;;  %v746_v9 = vadd.f32 %v745_v7, %v658_v60  ;;  %v829_v11 = vmax.f32 %v744_v5, 0.0  ;;  %v1057_v60 = vld [vmem:[#allocation11 + $0x8] sm:$0xff]  ;;  %1496 = vmatpush3.msra.mxu1 %v871_v0  ;;  %v869_v4 = vld [vmem:[#allocation10 + $0x120] sm:$0xff]  ;;  %v884_v5 = vld [vmem:[#allocation10 + $0x198] sm:$0xff] }
 0x144   :  { %969 = vmatmul.mubr.f32.vlgmr.msra.gmra.mxu0 %v825_v2  ;;  %v870_v2 = vld [vmem:[#allocation10 + $0x128] sm:$0xff]  ;;  %1497 = vmatprep.subr.mxu1 %v886_v61  ;;  %v883_v7 = vld [vmem:[#allocation10 + $0x190] sm:$0xff] }
 0x145   :  { %1516 = vmatpush3.msra.mxu0 %v1071_v6  ;;  %v830_v13 = vmax.f32 %v746_v9, 0.0  ;;  %1498 = vmatpush3.msra.mxu1 %v870_v2  ;;  %v868_v6 = vld [vmem:[#allocation10 + $0x118] sm:$0xff]  ;;  %v882_v9 = vld [vmem:[#allocation10 + $0x188] sm:$0xff]  ;;  %v1114_v0 = vld [vmem:[#allocation11 + $0x1d0] sm:$0xff] }
 0x146   :  { %1517 = vmatprep.subr.mxu0 %v1086_v8  ;;  %1499 = vmatprep.subr.mxu1 %v885_v3  ;;  %v867_v8 = vld [vmem:[#allocation10 + $0x110] sm:$0xff]  ;;  %v1113_v61 = vld [vmem:[#allocation11 + $0x1c8] sm:$0xff]  ;;  %v1112_v2 = vld [vmem:[#allocation11 + $0x1c0] sm:$0xff] }
 0x147   :  { %1518 = vmatpush3.msra.mxu0 %v1070_v10  ;;  %973 = vmatprep.mubr.f32.mxu0 %v830_v13  ;;  %v866_v10 = vld [vmem:[#allocation10 + $0x108] sm:$0xff]  ;;  %v1119_v13 = vld [vmem:[#allocation11 + $0x1f8] sm:$0xff]  ;;  %v1096_v3 = vld [vmem:[#allocation11 + $0x140] sm:$0xff] }
 0x148   :  { %1519 = vmatprep.subr.mxu0 %v1085_v12  ;;  %974 = vmatmul.mubr.f32.gmra.mxu0 %v829_v11  ;;  %v881_v11 = vld [vmem:[#allocation10 + $0x180] sm:$0xff] }
 0x149   :  { %1520 = vmatpush3.msra.mxu0 %v1069_v14  ;;  %1500 = vmatpush3.msra.mxu1 %v869_v4  ;;  %v865_v12 = vld [vmem:[#allocation10 + $0x100] sm:$0xff]  ;;  %v1111_v4 = vld [vmem:[#allocation11 + $0x1b8] sm:$0xff] }
 0x14a   :  { %1521 = vmatprep.subr.mxu0 %v1084_v15  ;;  %1501 = vmatprep.subr.mxu1 %v884_v5  ;;  %v1997_v14 = vld [vmem:[%s2043_s3] sm:$0xf]  ;;  %v1095_v5 = vld [vmem:[#allocation11 + $0x138] sm:$0xff] }
 0x14b   :  { %1522 = vmatpush3.msra.mxu0 %v1068_v16  ;;  %1502 = vmatpush3.msra.mxu1 %v868_v6  ;;  %v284_v15 = vrot.slane %v1997_v14, %v283_v56  ;;  %v288_v16 = vrot.slane %v1997_v14, %v287_v58  ;;  %v1110_v6 = vld [vmem:[#allocation11 + $0x1b0] sm:$0xff] }
 0x14c   :  { %1523 = vmatprep.subr.mxu0 %v1083_v17  ;;  %1503 = vmatprep.subr.mxu1 %v883_v7  ;;  %v1094_v7 = vld [vmem:[#allocation11 + $0x130] sm:$0xff] }
 0x14d   :  { %1524 = vmatpush3.msra.mxu0 %v1067_v18  ;;  %1504 = vmatpush3.msra.mxu1 %v867_v8  ;;  %v1109_v8 = vld [vmem:[#allocation11 + $0x1a8] sm:$0xff] }
 0x14e   :  { %1525 = vmatprep.subr.mxu0 %v1082_v19  ;;  %1505 = vmatprep.subr.mxu1 %v882_v9  ;;  %v1093_v9 = vld [vmem:[#allocation11 + $0x128] sm:$0xff] }
 0x14f   :  { %1526 = vmatpush3.msra.mxu0 %v1066_v20  ;;  %1506 = vmatpush3.msra.mxu1 %v866_v10  ;;  %v1108_v10 = vld [vmem:[#allocation11 + $0x1a0] sm:$0xff] }
 0x150   :  { %1527 = vmatprep.subr.mxu0 %v1081_v21  ;;  %1507 = vmatprep.subr.mxu1 %v881_v11  ;;  %v1092_v11 = vld [vmem:[#allocation11 + $0x120] sm:$0xff] }
 0x151   :  { %1528 = vmatpush3.msra.mxu0 %v1065_v23  ;;  %1508 = vmatpush3.msra.mxu1 %v865_v12  ;;  %v1107_v12 = vld [vmem:[#allocation11 + $0x198] sm:$0xff] }
 0x152   :  { %1529 = vmatprep.subr.mxu0 %v1080_v62  ;;  %1553 = vmatprep.subr.mxu1 %v1119_v13  ;;  %v292_v13 = vrot.slane %v1997_v14, %v291_v29 }
 0x153   :  { %1530 = vmatpush3.msra.mxu0 %v1064_v25 }
 0x154   :  { %1531 = vmatprep.subr.mxu0 %v1079_v30  ;;  %v295_v30 = vsub.s32 3, %v1951_v35  ;;  %v1088_v35 = vld [vmem:[#allocation11 + $0x100] sm:$0xff] }
 0x155   :  { %1532 = vmatpush3.msra.mxu0 %v1063_v32  ;;  %v662_v32 = vrot.slane %v1985_v57, %v291_v29  ;;  %v1129_v29 = vld [vmem:[#allocation11 + $0x248] sm:$0xff] }
 0x156   :  { %1533 = vmatprep.subr.mxu0 %v1078_v34  ;;  %v666_v33 = vrot.slane %v1985_v57, %v295_v30  ;;  %v2018_v38 = vrot.slane %v1997_v14, %v295_v30  ;;  %v1102_v57 = vld [vmem:[#allocation11 + $0x170] sm:$0xff]  ;;  %v1128_v30 = vld [vmem:[#allocation11 + $0x240] sm:$0xff] }
 0x157   :  { %1534 = vmatpush3.msra.mxu0 %v1062_v37 }
 0x158   :  { %1535 = vmatprep.subr.mxu0 %v1077_v39 }
 0x159   :  { %1536 = vmatpush3.msra.mxu0 %v1061_v41 }
 0x15a   :  { %1537 = vmatprep.subr.mxu0 %v1076_v43 }
 0x15b   :  { %1538 = vmatpush3.msra.mxu0 %v1060_v45  ;;  %v1103_v45 = vld [vmem:[#allocation11 + $0x178] sm:$0xff] }
 0x15c   :  { %1539 = vmatprep.subr.mxu0 %v1075_v47 }
 0x15d   :  { %1540 = vmatpush3.msra.mxu0 %v1059_v49 }
 0x15e   :  { %1541 = vmatprep.subr.mxu0 %v1074_v51 }
 0x15f   :  { %1542 = vmatpush3.msra.mxu0 %v1058_v53 }
 0x160   :  { %1543 = vmatprep.subr.mxu0 %v1073_v55  ;;  %v1100_v55 = vld [vmem:[#allocation11 + $0x160] sm:$0xff] }
 0x161   :  { %1544 = vmatpush3.msra.mxu0 %v1057_v60  ;;  %v1099_v60 = vld [vmem:[#allocation11 + $0x158] sm:$0xff] }
 0x162   :  { %1545 = vmatprep.subr.mxu0 %v1072_v63  ;;  %v1098_v63 = vld [vmem:[#allocation11 + $0x150] sm:$0xff] }
 0x163   :  { %1546 = vmatpush3.msra.mxu0 %v1056_v1  ;;  %v1097_v1 = vld [vmem:[#allocation11 + $0x148] sm:$0xff] }
 0x1bb   :  { %v487_v17 = vpop.f32.mrf.mxu1 }
 0x1bc   :  { %v488_v18 = vadd.f32 %v487_v17, %v284_v15  ;;  %v1090_v17 = vld [vmem:[#allocation11 + $0x110] sm:$0xff] }
 0x1bd   :  { %v489_v19 = vpop.f32.mrf.mxu1 }
 0x1be   :  { %v490_v20 = vadd.f32 %v489_v19, %v288_v16  ;;  %v575_v22 = vmax.f32 %v488_v18, 0.0  ;;  %v1105_v18 = vld [vmem:[#allocation11 + $0x188] sm:$0xff] }
 0x1c0   :  { %v576_v21 = vmax.f32 %v490_v20, 0.0  ;;  %v1089_v20 = vld [vmem:[#allocation11 + $0x108] sm:$0xff] }
 0x1c2   :  { %1207 = vmatprep.mubr.f32.mxu0 %v576_v21 }
 0x1c3   :  { %1208 = vmatmul.mubr.f32.vlgmr.msra.gmra.mxu0 %v575_v22  ;;  %v1104_v22 = vld [vmem:[#allocation11 + $0x180] sm:$0xff] }
 0x1c4   :  { %v493_v23 = vpop.f32.mrf.mxu1 }
 0x1c5   :  { %v494_v24 = vadd.f32 %v493_v23, %v284_v15  ;;  %v1091_v15 = vld [vmem:[#allocation11 + $0x118] sm:$0xff] }
 0x1c6   :  { %v495_v62 = vpop.f32.mrf.mxu1 }
 0x1c7   :  { %v496_v25 = vadd.f32 %v495_v62, %v288_v16  ;;  %v579_v27 = vmax.f32 %v494_v24, 0.0  ;;  %v1106_v16 = vld [vmem:[#allocation11 + $0x190] sm:$0xff]  ;;  %v1135_v62 = vld [vmem:[#allocation11 + $0x278] sm:$0xff] }
 0x1c8   :  { %v2005_v56 = vpop.f32.mrf.mxu1  ;;  %1609 = vmatprep.subr.mxu0 %v1135_v62 }
 0x1c9   :  { %v580_v26 = vmax.f32 %v496_v25, 0.0  ;;  %v565_v19 = vadd.f32 %v2005_v56, %v292_v13  ;;  %v1134_v25 = vld [vmem:[#allocation11 + $0x270] sm:$0xff]  ;;  %1610 = vmatpush3.msra.mxu0 %v1135_v62  ;;  %v1132_v56 = vld [vmem:[#allocation11 + $0x260] sm:$0xff] }
 0x1ca   :  { %v566_v28 = vpop.f32.mrf.mxu1  ;;  %1611 = vmatprep.subr.mxu0 %v1134_v25 }
 0x1cb   :  { %1212 = vmatprep.mubr.f32.mxu0 %v580_v26  ;;  %v567_v46 = vadd.f32 %v566_v28, %v2018_v38  ;;  %v577_v14 = vmax.f32 %v565_v19, 0.0  ;;  %1612 = vmatpush3.msra.mxu0 %v1134_v25  ;;  %v1131_v28 = vld [vmem:[#allocation11 + $0x258] sm:$0xff] }
 0x1cc   :  { %1213 = vmatmul.mubr.f32.gmra.mxu0 %v579_v27  ;;  %v2007_v58 = vpop.f32.mrf.mxu1  ;;  %v1133_v27 = vld [vmem:[#allocation11 + $0x268] sm:$0xff] }
 0x1cd   :  { %v578_v53 = vmax.f32 %v567_v46, 0.0  ;;  %v571_v23 = vadd.f32 %v2007_v58, %v292_v13  ;;  %1613 = vmatprep.subr.mxu0 %v1133_v27  ;;  %v1130_v58 = vld [vmem:[#allocation11 + $0x250] sm:$0xff] }
 0x1ce   :  { %v2011_v31 = vpop.f32.mrf.mxu1  ;;  %1614 = vmatpush3.msra.mxu0 %v1133_v27 }
 0x1cf   :  { %v573_v21 = vadd.f32 %v2011_v31, %v2018_v38  ;;  %v581_v26 = vmax.f32 %v571_v23, 0.0  ;;  %1615 = vmatprep.subr.mxu0 %v1132_v56  ;;  %v1127_v31 = vld [vmem:[#allocation11 + $0x238] sm:$0xff]  ;;  %v1121_v38 = vld [vmem:[#allocation11 + $0x208] sm:$0xff] }
 0x1d0   :  { %1616 = vmatpush3.msra.mxu0 %v1132_v56 }
 0x1d1   :  { %v582_v24 = vmax.f32 %v573_v21, 0.0  ;;  %1617 = vmatprep.subr.mxu0 %v1131_v28 }
 0x1d2   :  { %1618 = vmatpush3.msra.mxu0 %v1131_v28 }
 0x1d3   :  { %1619 = vmatprep.subr.mxu0 %v1130_v58 }
 0x1d4   :  { %1620 = vmatpush3.msra.mxu0 %v1130_v58 }
 0x1d5   :  { %1621 = vmatprep.subr.mxu0 %v1129_v29 }
 0x1d6   :  { %1622 = vmatpush3.msra.mxu0 %v1129_v29 }
 0x1d7   :  { %1623 = vmatprep.subr.mxu0 %v1128_v30 }
 0x1d8   :  { %1624 = vmatpush3.msra.mxu0 %v1128_v30 }
 0x1d9   :  { %1625 = vmatprep.subr.mxu0 %v1127_v31 }
 0x1da   :  { %1626 = vmatpush3.msra.mxu0 %v1127_v31 }
 0x1e8   :  { %v814_v34 = vpop.f32.mrf.mxu1 }
 0x1e9   :  { %v815_v36 = vadd.f32 %v814_v34, %v662_v32  ;;  %v1124_v34 = vld [vmem:[#allocation11 + $0x220] sm:$0xff] }
 0x1ea   :  { %v816_v37 = vpop.f32.mrf.mxu1 }
 0x1eb   :  { %v817_v39 = vadd.f32 %v816_v37, %v666_v33  ;;  %v827_v42 = vmax.f32 %v815_v36, 0.0  ;;  %v1123_v36 = vld [vmem:[#allocation11 + $0x218] sm:$0xff]  ;;  %v1122_v37 = vld [vmem:[#allocation11 + $0x210] sm:$0xff] }
 0x1ec   :  { %v820_v40 = vpop.f32.mrf.mxu1 }
 0x1ed   :  { %v828_v41 = vmax.f32 %v817_v39, 0.0  ;;  %v821_v43 = vadd.f32 %v820_v40, %v662_v32  ;;  %v1126_v32 = vld [vmem:[#allocation11 + $0x230] sm:$0xff]  ;;  %v1120_v39 = vld [vmem:[#allocation11 + $0x200] sm:$0xff] }
 0x1ee   :  { %v822_v44 = vpop.f32.mrf.mxu1  ;;  %1627 = vmatprep.subr.mxu0 %v1126_v32 }
 0x1ef   :  { %v823_v47 = vadd.f32 %v822_v44, %v666_v33  ;;  %1043 = vmatprep.mubr.f32.mxu1 %v828_v41  ;;  %v831_v51 = vmax.f32 %v821_v43, 0.0  ;;  %1628 = vmatpush3.msra.mxu0 %v1126_v32  ;;  %v1125_v33 = vld [vmem:[#allocation11 + $0x228] sm:$0xff]  ;;  %v1398_v44 = vld [vmem:[%s2047_s7] ss:$0 sm:$0xff] }
 0x1f0   :  { %1044 = vmatmul.mubr.f32.vlgmr.msra.gmra.mxu1 %v827_v42  ;;  %1629 = vmatprep.subr.mxu0 %v1125_v33 }
 0x1f1   :  { %v832_v49 = vmax.f32 %v823_v47, 0.0  ;;  %1554 = vmatpush3.msra.mxu1 %v1103_v45  ;;  %1630 = vmatpush3.msra.mxu0 %v1125_v33 }
 0x1f2   :  { %1555 = vmatprep.subr.mxu1 %v1118_v48  ;;  %1631 = vmatprep.subr.mxu0 %v1124_v34 }
 0x1f3   :  { %1556 = vmatpush3.msra.mxu1 %v1102_v57  ;;  %1048 = vmatprep.mubr.f32.mxu1 %v832_v49 }
 0x1f4   :  { %1557 = vmatprep.subr.mxu1 %v1117_v50  ;;  %1049 = vmatmul.mubr.f32.gmra.mxu1 %v831_v51 }
 0x1f5   :  { %1558 = vmatpush3.msra.mxu1 %v1101_v52  ;;  %1282 = vmatprep.mubr.f32.mxu1 %v578_v53 }
 0x1f6   :  { %1559 = vmatprep.subr.mxu1 %v1116_v54  ;;  %1632 = vmatpush3.msra.mxu0 %v1124_v34 }
 0x1f7   :  { %1560 = vmatpush3.msra.mxu1 %v1100_v55  ;;  %1633 = vmatprep.subr.mxu0 %v1123_v36 }
 0x1f8   :  { %1561 = vmatprep.subr.mxu1 %v1115_v59  ;;  %1634 = vmatpush3.msra.mxu0 %v1123_v36 }
 0x1f9   :  { %1562 = vmatpush3.msra.mxu1 %v1099_v60  ;;  %1635 = vmatprep.subr.mxu0 %v1122_v37 }
 0x1fa   :  { %1563 = vmatprep.subr.mxu1 %v1114_v0  ;;  %1636 = vmatpush3.msra.mxu0 %v1122_v37 }
 0x1fb   :  { %1564 = vmatpush3.msra.mxu1 %v1098_v63  ;;  %1637 = vmatprep.subr.mxu0 %v1121_v38 }
 0x1fc   :  { %1565 = vmatprep.subr.mxu1 %v1113_v61  ;;  %1638 = vmatpush3.msra.mxu0 %v1121_v38 }
 0x1fd   :  { %1566 = vmatpush3.msra.mxu1 %v1097_v1  ;;  %1639 = vmatprep.subr.mxu0 %v1120_v39 }
 0x1fe   :  { %1567 = vmatprep.subr.mxu1 %v1112_v2  ;;  %1640 = vmatpush3.msra.mxu0 %v1120_v39 }
 0x1ff   :  { %1568 = vmatpush3.msra.mxu1 %v1096_v3 }
 0x200   :  { %1569 = vmatprep.subr.mxu1 %v1111_v4 }
 0x201   :  { %1570 = vmatpush3.msra.mxu1 %v1095_v5 }
 0x202   :  { %1571 = vmatprep.subr.mxu1 %v1110_v6 }
 0x203   :  { %1572 = vmatpush3.msra.mxu1 %v1094_v7 }
 0x204   :  { %1573 = vmatprep.subr.mxu1 %v1109_v8  ;;  %v1471_v40 = vpop.f32.mrf.mxu0 }
 0x205   :  { %1574 = vmatpush3.msra.mxu1 %v1093_v9  ;;  %v1399_v9 = vld [vmem:[%s2049_s9] ss:$0 sm:$0xff] }
 0x206   :  { %1575 = vmatprep.subr.mxu1 %v1108_v10  ;;  %v1472_v41 = vpop.f32.mrf.mxu0 }
 0x207   :  { %1576 = vmatpush3.msra.mxu1 %v1092_v11  ;;  %v1473_v43 = vadd.f32 %v1472_v41, %v1471_v40 }
 0x208   :  { %1577 = vmatprep.subr.mxu1 %v1107_v12  ;;  %v1474_v42 = vpop.f32.mrf.mxu0 }
 0x209   :  { %1578 = vmatpush3.msra.mxu1 %v1091_v15  ;;  %v971_v48 = vadd.f32 %v1473_v43, %v1398_v44 }
 0x20a   :  { %1579 = vmatprep.subr.mxu1 %v1106_v16  ;;  %v1475_v46 = vpop.f32.mrf.mxu0 }
 0x20b   :  { %1580 = vmatpush3.msra.mxu1 %v1090_v17  ;;  %v1476_v57 = vadd.f32 %v1475_v46, %v1474_v42 }
 0x20c   :  { %1581 = vmatprep.subr.mxu1 %v1105_v18 }
 0x20d   :  { %1582 = vmatpush3.msra.mxu1 %v1089_v20  ;;  %v976_v53 = vadd.f32 %v1476_v57, %v1398_v44 }
 0x20e   :  { %1583 = vmatprep.subr.mxu1 %v1104_v22 }
 0x20f   :  { %1584 = vmatpush3.msra.mxu1 %v1088_v35 }
 0x210   :  { %1283 = vmatmul.mubr.f32.vlgmr.msra.gmra.mxu1 %v577_v14 }
 0x211   :  { %1287 = vmatprep.mubr.f32.mxu1 %v582_v24 }
 0x214   :  { %1288 = vmatmul.mubr.f32.gmra.mxu1 %v581_v26 }
 0x283   :  { %v1547_v0 = vpop.f32.mrf.mxu0 }
 0x285   :  { %v1548_v61 = vpop.f32.mrf.mxu0 }
 0x286   :  { %v1549_v7 = vadd.f32 %v1548_v61, %v1547_v0 }
 0x288   :  { %v1210_v12 = vadd.f32 %v1549_v7, %v1399_v9 }
 0x28c   :  { %v1550_v2 = vpop.f32.mrf.mxu0 }
 0x28e   :  { %v1551_v4 = vpop.f32.mrf.mxu0 }
 0x28f   :  { %v1552_v6 = vadd.f32 %v1551_v4, %v1550_v2 }
 0x291   :  { %v1215_v10 = vadd.f32 %v1552_v6, %v1399_v9 }
 0x2b0   :  { %v1509_v45 = vpop.f32.mrf.mxu1 }
 0x2b2   :  { %v1510_v47 = vpop.f32.mrf.mxu1 }
 0x2b3   :  { %v1511_v49 = vadd.f32 %v1510_v47, %v1509_v45 }
 0x2b4   :  { %v1512_v50 = vpop.f32.mrf.mxu1 }
 0x2b5   :  { %v1046_v51 = vadd.f32 %v1511_v49, %v971_v48 }
 0x2b6   :  { %v1513_v52 = vpop.f32.mrf.mxu1 }
 0x2b7   :  { %v1054_v54 = vmax.f32 %v1046_v51, 0.0  ;;  %v1514_v55 = vadd.f32 %v1513_v52, %v1512_v50 }
 0x2b9   :  { %v1051_v59 = vadd.f32 %v1514_v55, %v976_v53  ;;  %1641 = vmatprep.mubr.f32.mxu0 %v1054_v54 }
 0x2bb   :  { %v1055_v60 = vmax.f32 %v1051_v59, 0.0 }
 0x2bd   :  { %1642 = vmatmul.mubr.f32.vlgmr.msra.gmra.mxu0 %v1055_v60 }
 0x2d0   :  { %v1585_v63 = vpop.f32.mrf.mxu1 }
 0x2d2   :  { %v1586_v1 = vpop.f32.mrf.mxu1 }
 0x2d3   :  { %v1587_v11 = vadd.f32 %v1586_v1, %v1585_v63 }
 0x2d4   :  { %v1588_v3 = vpop.f32.mrf.mxu1 }
 0x2d5   :  { %v1285_v17 = vadd.f32 %v1587_v11, %v1210_v12 }
 0x2d6   :  { %v1589_v5 = vpop.f32.mrf.mxu1 }
 0x2d7   :  { %v1590_v8 = vadd.f32 %v1589_v5, %v1588_v3 }
 0x2d9   :  { %v1290_v13 = vadd.f32 %v1590_v8, %v1215_v10 }
 0x37d   :  { %v1643_v15 = vpop.f32.mrf.mxu0 }
 0x37e   :  { %v1365_v16 = vadd.f32 %v1643_v15, %v1290_v13 }
 0x37f   :  { %v1359_v18 = vpop.f32.mrf.mxu0 }
 0x380   :  { %1369 = vst [vmem:[#allocation13 + $0x8] sm:$0xff] %v1365_v16  ;;  %v1360_v19 = vadd.f32 %v1359_v18, %v1285_v17 }
 0x382   :  { %1368 = vst [vmem:[#allocation13] sm:$0xff] %v1360_v19 }
 0x383   :  { %1374 = vsyncadd [#allocation4], 224  ;;  %s1825_s12 = smov [#allocation13]  }
 0x384   :  { %s1375_s13 = sshll.u32 %s1825_s12, 4  ;;  %s1376_s13 = int_to_ptr.vmem [resolvable:$true] %s1375_s13 }
 0x385   :  { %s1781_s14 = scalar_lea.vmem %s1376_s13, 32  ;;  %s1785_s15 = scalar_lea.vmem %s1376_s13, 256 }
 0x386   :  { %p1782_p2 = scmp.ne.s32.totalorder %s1376_s13, %s1781_s14  ;;  %p1786_p3 = scmp.lt.s32.totalorder %s1376_s13, %s1376_s13 }
 0x387   :  { %p1787_p4 = scmp.lt.s32.totalorder %s1785_s15, %s1781_s14 }
 0x389   :  { %p1788_p5 = por %p1787_p4, %p1786_p3 }
 0x38b   :  { %p1789_p6 = pnand %p1788_p5, %p1782_p2 }
 0x38d   :  { %1792 = shalt.err (!%p1789_p6)
}
 0x38e   :  { %1381 = dma.vmem_to_hbm [thread:$0]  %s1376_s13, 32, %s2050_s10, [#allocation4], %s1815_s25, %s1815_s25, %s1816_s26  }
 0x38f   :  { %1809 = dma.done.wait [#allocation4], 256  }
 0x390   :  { %1810 = vsyncadd [#allocation4], 4294967040 }
 0x391   :  { %1385 = vsyncpa [#allocation3], 1 }
 0x392   :  { %1386 = vsyncpa [#allocation6], 1 }
 0x393   :  { %1387 = vsyncpa [#allocation9], 1 }
 0x394   :  { %1388 = vsyncpa [#allocation12], 1 }
 0x395   :  { %1389 = vsyncpa [#allocation4], 1 }

</bundles_post_ra>
